<compile_context>
chip_gen: v7x
topology: tpu7x:2x2x1
jax: 0.10.0
libtpu: 0.0.40
codegen_flags: <defaults>
</compile_context>

<pallas_src>
import functools
import math

import jax
import jax.numpy as jnp
from jax import lax
from jax.experimental import pallas as pl
from jax.experimental.pallas import tpu as pltpu


# ---------------------------------------------------------------------------
# Helpers
# ---------------------------------------------------------------------------
def _full_spec(shape):
    """Whole-array block for a (1,)-grid call; index_map gets (i, ids_ref)."""
    n = len(shape)
    return pl.BlockSpec(tuple(shape), lambda i, ids, _n=n: (0,) * _n)


def _layernorm(x, g, b, eps=1e-5):
    mean = jnp.mean(x, axis=-1, keepdims=True)
    xc = x - mean
    var = jnp.mean(jnp.square(xc), axis=-1, keepdims=True)
    return xc * lax.rsqrt(var + eps) * g + b


# ---------------------------------------------------------------------------
# Fused forward kernel
# ---------------------------------------------------------------------------
def _fused_forward_kernel(
    # scalar prefetch (SMEM)
    ids_ref,                                   # (B, S) int32
    # VMEM inputs (weights + mask bias)
    wte_ref, wpe_ref, mask_bias_ref,
    ln1_g_ref, ln1_b_ref, w_qkv_ref, b_qkv_ref, w_o_ref, b_o_ref,
    ln2_g_ref, ln2_b_ref, w_fc1_ref, b_fc1_ref, w_fc2_ref, b_fc2_ref,
    lnf_g_ref, lnf_b_ref, w_head_ref, b_head_ref,
    # output
    out_ref,                                   # (B*S, head_w) f32, lane-dense
    # scratch
    emb_ref, attn_ref,                         # (B*S, H) f32 each
    *, B, S, n_heads,
):
    H = w_o_ref.shape[0]
    dh = H // n_heads
    scale = 1.0 / math.sqrt(dh)

    # ---- embedding gather: token ids from SMEM, dynamic wte row reads -------
    # wte_ref is (V, 1, H) so the dynamic index sits on the leading (untiled) axis.
    for i in range(B * S):
        b, s_pos = divmod(i, S)
        tok = ids_ref[b, s_pos]
        emb_ref[pl.ds(i, 1), :] = wte_ref[tok] + wpe_ref[pl.ds(s_pos, 1), :]

    x = emb_ref[...]                                           # (B*S, H) f32

    # ---- attention block ----------------------------------------------------
    xn = _layernorm(x, ln1_g_ref[...], ln1_b_ref[...])
    qkv = jnp.dot(xn, w_qkv_ref[...],
                  preferred_element_type=jnp.float32) + b_qkv_ref[...]  # (B*S, 3H)

    qi = lax.broadcasted_iota(jnp.int32, (S, S), 0)
    ki = lax.broadcasted_iota(jnp.int32, (S, S), 1)
    causal_bias = jnp.where(ki <= qi, 0.0, -1e30).astype(jnp.float32)   # (S, S)
    key_bias = mask_bias_ref[...]                              # (B, S): 0 keep / -1e30 pad

    for h in range(n_heads):
        q_h = qkv[:, h * dh:(h + 1) * dh]
        k_h = qkv[:, H + h * dh: H + (h + 1) * dh]
        v_h = qkv[:, 2 * H + h * dh: 2 * H + (h + 1) * dh]
        for b in range(B):
            qb = q_h[b * S:(b + 1) * S, :]                     # (S, dh)
            kb = k_h[b * S:(b + 1) * S, :]
            vb = v_h[b * S:(b + 1) * S, :]
            s = lax.dot_general(qb, kb, (((1,), (1,)), ((), ())),
                                preferred_element_type=jnp.float32)     # (S, S)
            s = s * scale + causal_bias + key_bias[b:b + 1, :]
            m = jnp.max(s, axis=-1, keepdims=True)
            p = jnp.exp(s - m)
            denom = jnp.sum(p, axis=-1, keepdims=True)
            # NOTE: fully-masked (padded) query rows become uniform over masked
            # keys (never NaN); matches previous behaviour, only pad rows.
            p = p * pl.reciprocal(denom, approx=True)
            o_bh = jnp.dot(p, vb, preferred_element_type=jnp.float32)   # (S, dh)
            attn_ref[pl.ds(b * S, S), pl.ds(h * dh, dh)] = o_bh

    attn = jnp.dot(attn_ref[...], w_o_ref[...],
                   preferred_element_type=jnp.float32) + b_o_ref[...]
    x = x + attn

    # ---- MLP block ------------------------------------------------------------
    xn = _layernorm(x, ln2_g_ref[...], ln2_b_ref[...])
    h1 = jnp.dot(xn, w_fc1_ref[...],
                 preferred_element_type=jnp.float32) + b_fc1_ref[...]
    # Pinned explicitly: tanh ("gelu_new", GPT-2 style). PyTorch nn.GELU default
    # is exact erf; the synthetic base model here is GPT-style.
    h1 = jax.nn.gelu(h1, approximate=True)
    h2 = jnp.dot(h1, w_fc2_ref[...],
                 preferred_element_type=jnp.float32) + b_fc2_ref[...]
    x = x + h2

    # ---- final LN -> hidden_states[-1] ----------------------------------------
    hf = _layernorm(x, lnf_g_ref[...], lnf_b_ref[...])

    # ---- fused LM head + value head (lane-dense 128-wide padded output) -------
    out = jnp.dot(hf, w_head_ref[...],
                  preferred_element_type=jnp.float32) + b_head_ref[...]
    out_ref[...] = out.astype(out_ref.dtype)


# ---------------------------------------------------------------------------
# Synthetic base model + value head parameters
# ---------------------------------------------------------------------------
def init_params(key, *, vocab=64, max_seq=8, hidden=32, n_heads=2, mlp=128):
    ks = jax.random.split(key, 8)
    nrm = lambda k, s: (0.02 * jax.random.normal(k, s)).astype(jnp.float32)
    zeros = lambda s: jnp.zeros(s, jnp.float32)
    ones = lambda s: jnp.ones(s, jnp.float32)
    return dict(
        wte=nrm(ks[0], (vocab, hidden)),
        wpe=nrm(ks[1], (max_seq, hidden)),
        ln1_g=ones((hidden,)), ln1_b=zeros((hidden,)),
        w_qkv=nrm(ks[2], (hidden, 3 * hidden)), b_qkv=zeros((3 * hidden,)),
        w_o=nrm(ks[3], (hidden, hidden)), b_o=zeros((hidden,)),
        ln2_g=ones((hidden,)), ln2_b=zeros((hidden,)),
        w_fc1=nrm(ks[4], (hidden, mlp)), b_fc1=zeros((mlp,)),
        w_fc2=nrm(ks[5], (mlp, hidden)), b_fc2=zeros((hidden,)),
        lnf_g=ones((hidden,)), lnf_b=zeros((hidden,)),
        w_lm=nrm(ks[6], (hidden, vocab)), b_lm=zeros((vocab,)),
        # value_head = nn.Linear(hidden_size, 1)
        w_v=nrm(ks[7], (hidden, 1)), b_v=zeros((1,)),
    ), dict(vocab=vocab, hidden=hidden, n_heads=n_heads)


# ---------------------------------------------------------------------------
# PolicyWithValueHead.forward equivalent (single fused pallas_call)
# ---------------------------------------------------------------------------
@functools.partial(jax.jit, static_argnames=("n_heads",))
def policy_with_value_head(params, input_ids, attention_mask, *, n_heads):
    B, S = input_ids.shape
    V, H = params["wte"].shape
    head_w = ((V + 1 + 127) // 128) * 128          # lane-dense combined head width

    row = lambda a: a.reshape(1, -1)

    # Weight-side glue (tiny, one-time per call under jit):
    wte3 = params["wte"].reshape(V, 1, H)          # leading axis for dynamic gather
    mask_bias = (attention_mask.astype(jnp.float32) - 1.0) * 1e30   # 0 keep / -1e30 pad

    # Fold value head into LM head: extra column V of a 128-padded head matrix.
    w_head = jnp.zeros((H, head_w), jnp.float32)
    w_head = w_head.at[:, :V].set(params["w_lm"])
    w_head = w_head.at[:, V].set(params["w_v"][:, 0])
    b_head = jnp.zeros((1, head_w), jnp.float32)
    b_head = b_head.at[0, :V].set(params["b_lm"])
    b_head = b_head.at[0, V].set(params["b_v"][0])

    in_arrays = [
        wte3, params["wpe"], mask_bias,
        row(params["ln1_g"]), row(params["ln1_b"]),
        params["w_qkv"], row(params["b_qkv"]),
        params["w_o"], row(params["b_o"]),
        row(params["ln2_g"]), row(params["ln2_b"]),
        params["w_fc1"], row(params["b_fc1"]),
        params["w_fc2"], row(params["b_fc2"]),
        row(params["lnf_g"]), row(params["lnf_b"]),
        w_head, b_head,
    ]
    in_specs = [_full_spec(a.shape) for a in in_arrays]

    kernel = functools.partial(_fused_forward_kernel, B=B, S=S, n_heads=n_heads)

    combined = pl.pallas_call(
        kernel,
        grid_spec=pltpu.PrefetchScalarGridSpec(
            num_scalar_prefetch=1,                 # input_ids -> SMEM
            grid=(1,),
            in_specs=in_specs,
            out_specs=_full_spec((B * S, head_w)),
            scratch_shapes=[
                pltpu.VMEM((B * S, H), jnp.float32),   # embedding assembly
                pltpu.VMEM((B * S, H), jnp.float32),   # attention output assembly
            ],
        ),
        out_shape=jax.ShapeDtypeStruct((B * S, head_w), jnp.float32),
        compiler_params=pltpu.CompilerParams(
            dimension_semantics=("arbitrary",)),
    )(input_ids.astype(jnp.int32), *in_arrays)

    # outputs.logits
    logits = combined[:, :V].reshape(B, S, V)
    # last_hidden = hidden_states[-1][:, -1, :]; values = value_head(.).squeeze(-1)
    # (literal last position, matching the PyTorch reference — may be a pad token
    #  if sequences are right-padded)
    values = combined.reshape(B, S, head_w)[:, -1, V]           # (B,)
    return logits, values


# ---------------------------------------------------------------------------
if __name__ == "__main__":
    key = jax.random.PRNGKey(0)
    pkey, dkey = jax.random.split(key)

    B, S = 2, 8
    params, cfg = init_params(pkey, vocab=64, max_seq=S, hidden=32,
                              n_heads=2, mlp=128)

    input_ids = jax.random.randint(dkey, (B, S), 0, cfg["vocab"], dtype=jnp.int32)
    attention_mask = jnp.ones((B, S), dtype=jnp.int32)

    logits, values = policy_with_value_head(
        params, input_ids, attention_mask, n_heads=cfg["n_heads"])
    jax.block_until_ready((logits, values))

    assert logits.shape == (B, S, cfg["vocab"])
    assert values.shape == (B,)
    assert bool(jnp.all(jnp.isfinite(logits))) and bool(jnp.all(jnp.isfinite(values)))
    # TODO(synk): PyTorch module delegates to an arbitrary HF base model; here a
    # fixed 1-block synthetic GPT-style transformer stands in for `base_model`.
    print("KERNEL_OK")
</pallas_src>

<mosaic_0001>
module attributes {stable_mosaic.version = 11 : i64} {
  func.func @_fused_forward_kernel(%arg0: i32, %arg1: memref<2x8xi32, #tpu.memory_space<smem>>, %arg2: memref<64x1x32xf32, #tpu.memory_space<vmem>>, %arg3: memref<8x32xf32, #tpu.memory_space<vmem>>, %arg4: memref<2x8xf32, #tpu.memory_space<vmem>>, %arg5: memref<1x32xf32, #tpu.memory_space<vmem>>, %arg6: memref<1x32xf32, #tpu.memory_space<vmem>>, %arg7: memref<32x96xf32, #tpu.memory_space<vmem>>, %arg8: memref<1x96xf32, #tpu.memory_space<vmem>>, %arg9: memref<32x32xf32, #tpu.memory_space<vmem>>, %arg10: memref<1x32xf32, #tpu.memory_space<vmem>>, %arg11: memref<1x32xf32, #tpu.memory_space<vmem>>, %arg12: memref<1x32xf32, #tpu.memory_space<vmem>>, %arg13: memref<32x128xf32, #tpu.memory_space<vmem>>, %arg14: memref<1x128xf32, #tpu.memory_space<vmem>>, %arg15: memref<128x32xf32, #tpu.memory_space<vmem>>, %arg16: memref<1x32xf32, #tpu.memory_space<vmem>>, %arg17: memref<1x32xf32, #tpu.memory_space<vmem>>, %arg18: memref<1x32xf32, #tpu.memory_space<vmem>>, %arg19: memref<32x128xf32, #tpu.memory_space<vmem>>, %arg20: memref<1x128xf32, #tpu.memory_space<vmem>>, %arg21: memref<16x128xf32, #tpu.memory_space<vmem>>, %arg22: memref<16x32xf32, #tpu.memory_space<vmem>>, %arg23: memref<16x32xf32, #tpu.memory_space<vmem>>) attributes {dimension_semantics = [#tpu.dimension_semantics<arbitrary>], iteration_bounds = array<i64: 1>, scalar_prefetch = 1 : i64, scratch_operands = 2 : i64, tpu.core_type = #tpu.core_type<tc>, window_params = [{pipeline_mode = #tpu.pipeline_mode<synchronous>, transform_indices = @transform_0, window_bounds = array<i64: 64, 1, 32>}, {pipeline_mode = #tpu.pipeline_mode<synchronous>, transform_indices = @transform_1, window_bounds = array<i64: 8, 32>}, {pipeline_mode = #tpu.pipeline_mode<synchronous>, transform_indices = @transform_2, window_bounds = array<i64: 2, 8>}, {pipeline_mode = #tpu.pipeline_mode<synchronous>, transform_indices = @transform_3, window_bounds = array<i64: 1, 32>}, {pipeline_mode = #tpu.pipeline_mode<synchronous>, transform_indices = @transform_4, window_bounds = array<i64: 1, 32>}, {pipeline_mode = #tpu.pipeline_mode<synchronous>, transform_indices = @transform_5, window_bounds = array<i64: 32, 96>}, {pipeline_mode = #tpu.pipeline_mode<synchronous>, transform_indices = @transform_6, window_bounds = array<i64: 1, 96>}, {pipeline_mode = #tpu.pipeline_mode<synchronous>, transform_indices = @transform_7, window_bounds = array<i64: 32, 32>}, {pipeline_mode = #tpu.pipeline_mode<synchronous>, transform_indices = @transform_8, window_bounds = array<i64: 1, 32>}, {pipeline_mode = #tpu.pipeline_mode<synchronous>, transform_indices = @transform_9, window_bounds = array<i64: 1, 32>}, {pipeline_mode = #tpu.pipeline_mode<synchronous>, transform_indices = @transform_10, window_bounds = array<i64: 1, 32>}, {pipeline_mode = #tpu.pipeline_mode<synchronous>, transform_indices = @transform_11, window_bounds = array<i64: 32, 128>}, {pipeline_mode = #tpu.pipeline_mode<synchronous>, transform_indices = @transform_12, window_bounds = array<i64: 1, 128>}, {pipeline_mode = #tpu.pipeline_mode<synchronous>, transform_indices = @transform_13, window_bounds = array<i64: 128, 32>}, {pipeline_mode = #tpu.pipeline_mode<synchronous>, transform_indices = @transform_14, window_bounds = array<i64: 1, 32>}, {pipeline_mode = #tpu.pipeline_mode<synchronous>, transform_indices = @transform_15, window_bounds = array<i64: 1, 32>}, {pipeline_mode = #tpu.pipeline_mode<synchronous>, transform_indices = @transform_16, window_bounds = array<i64: 1, 32>}, {pipeline_mode = #tpu.pipeline_mode<synchronous>, transform_indices = @transform_17, window_bounds = array<i64: 32, 128>}, {pipeline_mode = #tpu.pipeline_mode<synchronous>, transform_indices = @transform_18, window_bounds = array<i64: 1, 128>}, {pipeline_mode = #tpu.pipeline_mode<synchronous>, transform_indices = @transform_19, window_bounds = array<i64: 16, 128>}]} {
    %c0 = arith.constant 0 : index
    %c0_0 = arith.constant 0 : index
    %0 = memref.load %arg1[%c0, %c0_0] : memref<2x8xi32, #tpu.memory_space<smem>>
    %1 = arith.index_cast %0 : i32 to index
    %c0_1 = arith.constant 0 : index
    %c0_2 = arith.constant 0 : index
    %2 = vector.load %arg2[%1, %c0_1, %c0_2] : memref<64x1x32xf32, #tpu.memory_space<vmem>>, vector<1x1x32xf32>
    %3 = vector.shape_cast %2 : vector<1x1x32xf32> to vector<1x32xf32>
    %c0_3 = arith.constant 0 : index
    %c0_4 = arith.constant 0 : index
    %4 = vector.load %arg3[%c0_3, %c0_4] : memref<8x32xf32, #tpu.memory_space<vmem>>, vector<1x32xf32>
    %5 = arith.addf %3, %4 : vector<1x32xf32>
    %c0_5 = arith.constant 0 : index
    %c0_6 = arith.constant 0 : index
    %6 = vector.load %arg22[%c0_5, %c0_6] : memref<16x32xf32, #tpu.memory_space<vmem>>, vector<1x32xf32>
    tpu.vector_store %arg22[%c0_5, %c0_6], %5 {strides = array<i32>} : memref<16x32xf32, #tpu.memory_space<vmem>>, vector<1x32xf32>,
    %c0_7 = arith.constant 0 : index
    %c1 = arith.constant 1 : index
    %7 = memref.load %arg1[%c0_7, %c1] : memref<2x8xi32, #tpu.memory_space<smem>>
    %8 = arith.index_cast %7 : i32 to index
    %c0_8 = arith.constant 0 : index
    %c0_9 = arith.constant 0 : index
    %9 = vector.load %arg2[%8, %c0_8, %c0_9] : memref<64x1x32xf32, #tpu.memory_space<vmem>>, vector<1x1x32xf32>
    %10 = vector.shape_cast %9 : vector<1x1x32xf32> to vector<1x32xf32>
    %c1_10 = arith.constant 1 : index
    %c0_11 = arith.constant 0 : index
    %11 = vector.load %arg3[%c1_10, %c0_11] : memref<8x32xf32, #tpu.memory_space<vmem>>, vector<1x32xf32>
    %12 = arith.addf %10, %11 : vector<1x32xf32>
    %c1_12 = arith.constant 1 : index
    %c0_13 = arith.constant 0 : index
    %13 = vector.load %arg22[%c1_12, %c0_13] : memref<16x32xf32, #tpu.memory_space<vmem>>, vector<1x32xf32>
    tpu.vector_store %arg22[%c1_12, %c0_13], %12 {strides = array<i32>} : memref<16x32xf32, #tpu.memory_space<vmem>>, vector<1x32xf32>,
    %c0_14 = arith.constant 0 : index
    %c2 = arith.constant 2 : index
    %14 = memref.load %arg1[%c0_14, %c2] : memref<2x8xi32, #tpu.memory_space<smem>>
    %15 = arith.index_cast %14 : i32 to index
    %c0_15 = arith.constant 0 : index
    %c0_16 = arith.constant 0 : index
    %16 = vector.load %arg2[%15, %c0_15, %c0_16] : memref<64x1x32xf32, #tpu.memory_space<vmem>>, vector<1x1x32xf32>
    %17 = vector.shape_cast %16 : vector<1x1x32xf32> to vector<1x32xf32>
    %c2_17 = arith.constant 2 : index
    %c0_18 = arith.constant 0 : index
    %18 = vector.load %arg3[%c2_17, %c0_18] : memref<8x32xf32, #tpu.memory_space<vmem>>, vector<1x32xf32>
    %19 = arith.addf %17, %18 : vector<1x32xf32>
    %c2_19 = arith.constant 2 : index
    %c0_20 = arith.constant 0 : index
    %20 = vector.load %arg22[%c2_19, %c0_20] : memref<16x32xf32, #tpu.memory_space<vmem>>, vector<1x32xf32>
    tpu.vector_store %arg22[%c2_19, %c0_20], %19 {strides = array<i32>} : memref<16x32xf32, #tpu.memory_space<vmem>>, vector<1x32xf32>,
    %c0_21 = arith.constant 0 : index
    %c3 = arith.constant 3 : index
    %21 = memref.load %arg1[%c0_21, %c3] : memref<2x8xi32, #tpu.memory_space<smem>>
    %22 = arith.index_cast %21 : i32 to index
    %c0_22 = arith.constant 0 : index
    %c0_23 = arith.constant 0 : index
    %23 = vector.load %arg2[%22, %c0_22, %c0_23] : memref<64x1x32xf32, #tpu.memory_space<vmem>>, vector<1x1x32xf32>
    %24 = vector.shape_cast %23 : vector<1x1x32xf32> to vector<1x32xf32>
    %c3_24 = arith.constant 3 : index
    %c0_25 = arith.constant 0 : index
    %25 = vector.load %arg3[%c3_24, %c0_25] : memref<8x32xf32, #tpu.memory_space<vmem>>, vector<1x32xf32>
    %26 = arith.addf %24, %25 : vector<1x32xf32>
    %c3_26 = arith.constant 3 : index
    %c0_27 = arith.constant 0 : index
    %27 = vector.load %arg22[%c3_26, %c0_27] : memref<16x32xf32, #tpu.memory_space<vmem>>, vector<1x32xf32>
    tpu.vector_store %arg22[%c3_26, %c0_27], %26 {strides = array<i32>} : memref<16x32xf32, #tpu.memory_space<vmem>>, vector<1x32xf32>,
    %c0_28 = arith.constant 0 : index
    %c4 = arith.constant 4 : index
    %28 = memref.load %arg1[%c0_28, %c4] : memref<2x8xi32, #tpu.memory_space<smem>>
    %29 = arith.index_cast %28 : i32 to index
    %c0_29 = arith.constant 0 : index
    %c0_30 = arith.constant 0 : index
    %30 = vector.load %arg2[%29, %c0_29, %c0_30] : memref<64x1x32xf32, #tpu.memory_space<vmem>>, vector<1x1x32xf32>
    %31 = vector.shape_cast %30 : vector<1x1x32xf32> to vector<1x32xf32>
    %c4_31 = arith.constant 4 : index
    %c0_32 = arith.constant 0 : index
    %32 = vector.load %arg3[%c4_31, %c0_32] : memref<8x32xf32, #tpu.memory_space<vmem>>, vector<1x32xf32>
    %33 = arith.addf %31, %32 : vector<1x32xf32>
    %c4_33 = arith.constant 4 : index
    %c0_34 = arith.constant 0 : index
    %34 = vector.load %arg22[%c4_33, %c0_34] : memref<16x32xf32, #tpu.memory_space<vmem>>, vector<1x32xf32>
    tpu.vector_store %arg22[%c4_33, %c0_34], %33 {strides = array<i32>} : memref<16x32xf32, #tpu.memory_space<vmem>>, vector<1x32xf32>,
    %c0_35 = arith.constant 0 : index
    %c5 = arith.constant 5 : index
    %35 = memref.load %arg1[%c0_35, %c5] : memref<2x8xi32, #tpu.memory_space<smem>>
    %36 = arith.index_cast %35 : i32 to index
    %c0_36 = arith.constant 0 : index
    %c0_37 = arith.constant 0 : index
    %37 = vector.load %arg2[%36, %c0_36, %c0_37] : memref<64x1x32xf32, #tpu.memory_space<vmem>>, vector<1x1x32xf32>
    %38 = vector.shape_cast %37 : vector<1x1x32xf32> to vector<1x32xf32>
    %c5_38 = arith.constant 5 : index
    %c0_39 = arith.constant 0 : index
    %39 = vector.load %arg3[%c5_38, %c0_39] : memref<8x32xf32, #tpu.memory_space<vmem>>, vector<1x32xf32>
    %40 = arith.addf %38, %39 : vector<1x32xf32>
    %c5_40 = arith.constant 5 : index
    %c0_41 = arith.constant 0 : index
    %41 = vector.load %arg22[%c5_40, %c0_41] : memref<16x32xf32, #tpu.memory_space<vmem>>, vector<1x32xf32>
    tpu.vector_store %arg22[%c5_40, %c0_41], %40 {strides = array<i32>} : memref<16x32xf32, #tpu.memory_space<vmem>>, vector<1x32xf32>,
    %c0_42 = arith.constant 0 : index
    %c6 = arith.constant 6 : index
    %42 = memref.load %arg1[%c0_42, %c6] : memref<2x8xi32, #tpu.memory_space<smem>>
    %43 = arith.index_cast %42 : i32 to index
    %c0_43 = arith.constant 0 : index
    %c0_44 = arith.constant 0 : index
    %44 = vector.load %arg2[%43, %c0_43, %c0_44] : memref<64x1x32xf32, #tpu.memory_space<vmem>>, vector<1x1x32xf32>
    %45 = vector.shape_cast %44 : vector<1x1x32xf32> to vector<1x32xf32>
    %c6_45 = arith.constant 6 : index
    %c0_46 = arith.constant 0 : index
    %46 = vector.load %arg3[%c6_45, %c0_46] : memref<8x32xf32, #tpu.memory_space<vmem>>, vector<1x32xf32>
    %47 = arith.addf %45, %46 : vector<1x32xf32>
    %c6_47 = arith.constant 6 : index
    %c0_48 = arith.constant 0 : index
    %48 = vector.load %arg22[%c6_47, %c0_48] : memref<16x32xf32, #tpu.memory_space<vmem>>, vector<1x32xf32>
    tpu.vector_store %arg22[%c6_47, %c0_48], %47 {strides = array<i32>} : memref<16x32xf32, #tpu.memory_space<vmem>>, vector<1x32xf32>,
    %c0_49 = arith.constant 0 : index
    %c7 = arith.constant 7 : index
    %49 = memref.load %arg1[%c0_49, %c7] : memref<2x8xi32, #tpu.memory_space<smem>>
    %50 = arith.index_cast %49 : i32 to index
    %c0_50 = arith.constant 0 : index
    %c0_51 = arith.constant 0 : index
    %51 = vector.load %arg2[%50, %c0_50, %c0_51] : memref<64x1x32xf32, #tpu.memory_space<vmem>>, vector<1x1x32xf32>
    %52 = vector.shape_cast %51 : vector<1x1x32xf32> to vector<1x32xf32>
    %c7_52 = arith.constant 7 : index
    %c0_53 = arith.constant 0 : index
    %53 = vector.load %arg3[%c7_52, %c0_53] : memref<8x32xf32, #tpu.memory_space<vmem>>, vector<1x32xf32>
    %54 = arith.addf %52, %53 : vector<1x32xf32>
    %c7_54 = arith.constant 7 : index
    %c0_55 = arith.constant 0 : index
    %55 = vector.load %arg22[%c7_54, %c0_55] : memref<16x32xf32, #tpu.memory_space<vmem>>, vector<1x32xf32>
    tpu.vector_store %arg22[%c7_54, %c0_55], %54 {strides = array<i32>} : memref<16x32xf32, #tpu.memory_space<vmem>>, vector<1x32xf32>,
    %c1_56 = arith.constant 1 : index
    %c0_57 = arith.constant 0 : index
    %56 = memref.load %arg1[%c1_56, %c0_57] : memref<2x8xi32, #tpu.memory_space<smem>>
    %57 = arith.index_cast %56 : i32 to index
    %c0_58 = arith.constant 0 : index
    %c0_59 = arith.constant 0 : index
    %58 = vector.load %arg2[%57, %c0_58, %c0_59] : memref<64x1x32xf32, #tpu.memory_space<vmem>>, vector<1x1x32xf32>
    %59 = vector.shape_cast %58 : vector<1x1x32xf32> to vector<1x32xf32>
    %c0_60 = arith.constant 0 : index
    %c0_61 = arith.constant 0 : index
    %60 = vector.load %arg3[%c0_60, %c0_61] : memref<8x32xf32, #tpu.memory_space<vmem>>, vector<1x32xf32>
    %61 = arith.addf %59, %60 : vector<1x32xf32>
    %c8 = arith.constant 8 : index
    %c0_62 = arith.constant 0 : index
    %62 = vector.load %arg22[%c8, %c0_62] : memref<16x32xf32, #tpu.memory_space<vmem>>, vector<1x32xf32>
    tpu.vector_store %arg22[%c8, %c0_62], %61 {strides = array<i32>} : memref<16x32xf32, #tpu.memory_space<vmem>>, vector<1x32xf32>,
    %c1_63 = arith.constant 1 : index
    %c1_64 = arith.constant 1 : index
    %63 = memref.load %arg1[%c1_63, %c1_64] : memref<2x8xi32, #tpu.memory_space<smem>>
    %64 = arith.index_cast %63 : i32 to index
    %c0_65 = arith.constant 0 : index
    %c0_66 = arith.constant 0 : index
    %65 = vector.load %arg2[%64, %c0_65, %c0_66] : memref<64x1x32xf32, #tpu.memory_space<vmem>>, vector<1x1x32xf32>
    %66 = vector.shape_cast %65 : vector<1x1x32xf32> to vector<1x32xf32>
    %c1_67 = arith.constant 1 : index
    %c0_68 = arith.constant 0 : index
    %67 = vector.load %arg3[%c1_67, %c0_68] : memref<8x32xf32, #tpu.memory_space<vmem>>, vector<1x32xf32>
    %68 = arith.addf %66, %67 : vector<1x32xf32>
    %c9 = arith.constant 9 : index
    %c0_69 = arith.constant 0 : index
    %69 = vector.load %arg22[%c9, %c0_69] : memref<16x32xf32, #tpu.memory_space<vmem>>, vector<1x32xf32>
    tpu.vector_store %arg22[%c9, %c0_69], %68 {strides = array<i32>} : memref<16x32xf32, #tpu.memory_space<vmem>>, vector<1x32xf32>,
    %c1_70 = arith.constant 1 : index
    %c2_71 = arith.constant 2 : index
    %70 = memref.load %arg1[%c1_70, %c2_71] : memref<2x8xi32, #tpu.memory_space<smem>>
    %71 = arith.index_cast %70 : i32 to index
    %c0_72 = arith.constant 0 : index
    %c0_73 = arith.constant 0 : index
    %72 = vector.load %arg2[%71, %c0_72, %c0_73] : memref<64x1x32xf32, #tpu.memory_space<vmem>>, vector<1x1x32xf32>
    %73 = vector.shape_cast %72 : vector<1x1x32xf32> to vector<1x32xf32>
    %c2_74 = arith.constant 2 : index
    %c0_75 = arith.constant 0 : index
    %74 = vector.load %arg3[%c2_74, %c0_75] : memref<8x32xf32, #tpu.memory_space<vmem>>, vector<1x32xf32>
    %75 = arith.addf %73, %74 : vector<1x32xf32>
    %c10 = arith.constant 10 : index
    %c0_76 = arith.constant 0 : index
    %76 = vector.load %arg22[%c10, %c0_76] : memref<16x32xf32, #tpu.memory_space<vmem>>, vector<1x32xf32>
    tpu.vector_store %arg22[%c10, %c0_76], %75 {strides = array<i32>} : memref<16x32xf32, #tpu.memory_space<vmem>>, vector<1x32xf32>,
    %c1_77 = arith.constant 1 : index
    %c3_78 = arith.constant 3 : index
    %77 = memref.load %arg1[%c1_77, %c3_78] : memref<2x8xi32, #tpu.memory_space<smem>>
    %78 = arith.index_cast %77 : i32 to index
    %c0_79 = arith.constant 0 : index
    %c0_80 = arith.constant 0 : index
    %79 = vector.load %arg2[%78, %c0_79, %c0_80] : memref<64x1x32xf32, #tpu.memory_space<vmem>>, vector<1x1x32xf32>
    %80 = vector.shape_cast %79 : vector<1x1x32xf32> to vector<1x32xf32>
    %c3_81 = arith.constant 3 : index
    %c0_82 = arith.constant 0 : index
    %81 = vector.load %arg3[%c3_81, %c0_82] : memref<8x32xf32, #tpu.memory_space<vmem>>, vector<1x32xf32>
    %82 = arith.addf %80, %81 : vector<1x32xf32>
    %c11 = arith.constant 11 : index
    %c0_83 = arith.constant 0 : index
    %83 = vector.load %arg22[%c11, %c0_83] : memref<16x32xf32, #tpu.memory_space<vmem>>, vector<1x32xf32>
    tpu.vector_store %arg22[%c11, %c0_83], %82 {strides = array<i32>} : memref<16x32xf32, #tpu.memory_space<vmem>>, vector<1x32xf32>,
    %c1_84 = arith.constant 1 : index
    %c4_85 = arith.constant 4 : index
    %84 = memref.load %arg1[%c1_84, %c4_85] : memref<2x8xi32, #tpu.memory_space<smem>>
    %85 = arith.index_cast %84 : i32 to index
    %c0_86 = arith.constant 0 : index
    %c0_87 = arith.constant 0 : index
    %86 = vector.load %arg2[%85, %c0_86, %c0_87] : memref<64x1x32xf32, #tpu.memory_space<vmem>>, vector<1x1x32xf32>
    %87 = vector.shape_cast %86 : vector<1x1x32xf32> to vector<1x32xf32>
    %c4_88 = arith.constant 4 : index
    %c0_89 = arith.constant 0 : index
    %88 = vector.load %arg3[%c4_88, %c0_89] : memref<8x32xf32, #tpu.memory_space<vmem>>, vector<1x32xf32>
    %89 = arith.addf %87, %88 : vector<1x32xf32>
    %c12 = arith.constant 12 : index
    %c0_90 = arith.constant 0 : index
    %90 = vector.load %arg22[%c12, %c0_90] : memref<16x32xf32, #tpu.memory_space<vmem>>, vector<1x32xf32>
    tpu.vector_store %arg22[%c12, %c0_90], %89 {strides = array<i32>} : memref<16x32xf32, #tpu.memory_space<vmem>>, vector<1x32xf32>,
    %c1_91 = arith.constant 1 : index
    %c5_92 = arith.constant 5 : index
    %91 = memref.load %arg1[%c1_91, %c5_92] : memref<2x8xi32, #tpu.memory_space<smem>>
    %92 = arith.index_cast %91 : i32 to index
    %c0_93 = arith.constant 0 : index
    %c0_94 = arith.constant 0 : index
    %93 = vector.load %arg2[%92, %c0_93, %c0_94] : memref<64x1x32xf32, #tpu.memory_space<vmem>>, vector<1x1x32xf32>
    %94 = vector.shape_cast %93 : vector<1x1x32xf32> to vector<1x32xf32>
    %c5_95 = arith.constant 5 : index
    %c0_96 = arith.constant 0 : index
    %95 = vector.load %arg3[%c5_95, %c0_96] : memref<8x32xf32, #tpu.memory_space<vmem>>, vector<1x32xf32>
    %96 = arith.addf %94, %95 : vector<1x32xf32>
    %c13 = arith.constant 13 : index
    %c0_97 = arith.constant 0 : index
    %97 = vector.load %arg22[%c13, %c0_97] : memref<16x32xf32, #tpu.memory_space<vmem>>, vector<1x32xf32>
    tpu.vector_store %arg22[%c13, %c0_97], %96 {strides = array<i32>} : memref<16x32xf32, #tpu.memory_space<vmem>>, vector<1x32xf32>,
    %c1_98 = arith.constant 1 : index
    %c6_99 = arith.constant 6 : index
    %98 = memref.load %arg1[%c1_98, %c6_99] : memref<2x8xi32, #tpu.memory_space<smem>>
    %99 = arith.index_cast %98 : i32 to index
    %c0_100 = arith.constant 0 : index
    %c0_101 = arith.constant 0 : index
    %100 = vector.load %arg2[%99, %c0_100, %c0_101] : memref<64x1x32xf32, #tpu.memory_space<vmem>>, vector<1x1x32xf32>
    %101 = vector.shape_cast %100 : vector<1x1x32xf32> to vector<1x32xf32>
    %c6_102 = arith.constant 6 : index
    %c0_103 = arith.constant 0 : index
    %102 = vector.load %arg3[%c6_102, %c0_103] : memref<8x32xf32, #tpu.memory_space<vmem>>, vector<1x32xf32>
    %103 = arith.addf %101, %102 : vector<1x32xf32>
    %c14 = arith.constant 14 : index
    %c0_104 = arith.constant 0 : index
    %104 = vector.load %arg22[%c14, %c0_104] : memref<16x32xf32, #tpu.memory_space<vmem>>, vector<1x32xf32>
    tpu.vector_store %arg22[%c14, %c0_104], %103 {strides = array<i32>} : memref<16x32xf32, #tpu.memory_space<vmem>>, vector<1x32xf32>,
    %c1_105 = arith.constant 1 : index
    %c7_106 = arith.constant 7 : index
    %105 = memref.load %arg1[%c1_105, %c7_106] : memref<2x8xi32, #tpu.memory_space<smem>>
    %106 = arith.index_cast %105 : i32 to index
    %c0_107 = arith.constant 0 : index
    %c0_108 = arith.constant 0 : index
    %107 = vector.load %arg2[%106, %c0_107, %c0_108] : memref<64x1x32xf32, #tpu.memory_space<vmem>>, vector<1x1x32xf32>
    %108 = vector.shape_cast %107 : vector<1x1x32xf32> to vector<1x32xf32>
    %c7_109 = arith.constant 7 : index
    %c0_110 = arith.constant 0 : index
    %109 = vector.load %arg3[%c7_109, %c0_110] : memref<8x32xf32, #tpu.memory_space<vmem>>, vector<1x32xf32>
    %110 = arith.addf %108, %109 : vector<1x32xf32>
    %c15 = arith.constant 15 : index
    %c0_111 = arith.constant 0 : index
    %111 = vector.load %arg22[%c15, %c0_111] : memref<16x32xf32, #tpu.memory_space<vmem>>, vector<1x32xf32>
    tpu.vector_store %arg22[%c15, %c0_111], %110 {strides = array<i32>} : memref<16x32xf32, #tpu.memory_space<vmem>>, vector<1x32xf32>,
    %c0_112 = arith.constant 0 : index
    %c0_113 = arith.constant 0 : index
    %112 = vector.load %arg22[%c0_112, %c0_113] : memref<16x32xf32, #tpu.memory_space<vmem>>, vector<16x32xf32>
    %c0_114 = arith.constant 0 : index
    %c0_115 = arith.constant 0 : index
    %113 = vector.load %arg5[%c0_114, %c0_115] : memref<1x32xf32, #tpu.memory_space<vmem>>, vector<1x32xf32>
    %c0_116 = arith.constant 0 : index
    %c0_117 = arith.constant 0 : index
    %114 = vector.load %arg6[%c0_116, %c0_117] : memref<1x32xf32, #tpu.memory_space<vmem>>, vector<1x32xf32>
    %cst = arith.constant dense<0.000000e+00> : vector<16xf32>
    %115 = vector.multi_reduction <add>, %112, %cst [1] : vector<16x32xf32> to vector<16xf32>
    %116 = vector.shape_cast %115 : vector<16xf32> to vector<16x1xf32>
    %cst_118 = arith.constant 3.200000e+01 : f32
    %117 = vector.broadcast %cst_118 : f32 to vector<16x1xf32>
    %118 = arith.divf %116, %117 : vector<16x1xf32>
    %119 = vector.broadcast %118 : vector<16x1xf32> to vector<16x32xf32>
    %120 = arith.subf %112, %119 : vector<16x32xf32>
    %121 = arith.mulf %120, %120 : vector<16x32xf32>
    %cst_119 = arith.constant dense<0.000000e+00> : vector<16xf32>
    %122 = vector.multi_reduction <add>, %121, %cst_119 [1] : vector<16x32xf32> to vector<16xf32>
    %123 = vector.shape_cast %122 : vector<16xf32> to vector<16x1xf32>
    %cst_120 = arith.constant 3.200000e+01 : f32
    %124 = vector.broadcast %cst_120 : f32 to vector<16x1xf32>
    %125 = arith.divf %123, %124 : vector<16x1xf32>
    %cst_121 = arith.constant 9.99999974E-6 : f32
    %126 = vector.broadcast %cst_121 : f32 to vector<16x1xf32>
    %127 = arith.addf %125, %126 : vector<16x1xf32>
    %128 = math.rsqrt %127 : vector<16x1xf32>
    %129 = vector.broadcast %128 : vector<16x1xf32> to vector<16x32xf32>
    %130 = arith.mulf %120, %129 : vector<16x32xf32>
    %131 = vector.broadcast %113 : vector<1x32xf32> to vector<16x32xf32>
    %132 = arith.mulf %130, %131 : vector<16x32xf32>
    %133 = vector.broadcast %114 : vector<1x32xf32> to vector<16x32xf32>
    %134 = arith.addf %132, %133 : vector<16x32xf32>
    %c0_122 = arith.constant 0 : index
    %c0_123 = arith.constant 0 : index
    %135 = vector.load %arg7[%c0_122, %c0_123] : memref<32x96xf32, #tpu.memory_space<vmem>>, vector<32x96xf32>
    %cst_124 = arith.constant dense<0.000000e+00> : vector<16x96xf32>
    %136 = tpu.matmul %134, %135, %cst_124 {dimension_numbers = #tpu.dot_dimension_numbers<[1], [0], [0], [1], [0, 0, 1, 1], [], []>} : vector<16x32xf32>, vector<32x96xf32>, vector<16x96xf32> -> vector<16x96xf32>
    %c0_125 = arith.constant 0 : index
    %c0_126 = arith.constant 0 : index
    %137 = vector.load %arg8[%c0_125, %c0_126] : memref<1x96xf32, #tpu.memory_space<vmem>>, vector<1x96xf32>
    %138 = vector.broadcast %137 : vector<1x96xf32> to vector<16x96xf32>
    %139 = arith.addf %136, %138 : vector<16x96xf32>
    %140 = tpu.iota {dimensions = array<i32: 0>} : vector<8x8xi32>
    %141 = tpu.iota {dimensions = array<i32: 1>} : vector<8x8xi32>
    %142 = arith.cmpi sle, %141, %140 : vector<8x8xi32>
    %cst_127 = arith.constant 0.000000e+00 : f32
    %cst_128 = arith.constant -1.000000e+30 : f32
    %143 = vector.broadcast %cst_127 : f32 to vector<8x8xf32>
    %144 = vector.broadcast %cst_128 : f32 to vector<8x8xf32>
    %145 = arith.select %142, %143, %144 : vector<8x8xi1>, vector<8x8xf32>
    %c0_129 = arith.constant 0 : index
    %c0_130 = arith.constant 0 : index
    %146 = vector.load %arg4[%c0_129, %c0_130] : memref<2x8xf32, #tpu.memory_space<vmem>>, vector<2x8xf32>
    %147 = vector.extract_strided_slice %139 {offsets = [0, 0], sizes = [16, 16], strides = [1, 1]} : vector<16x96xf32> to vector<16x16xf32>
    %148 = vector.extract_strided_slice %139 {offsets = [0, 32], sizes = [16, 16], strides = [1, 1]} : vector<16x96xf32> to vector<16x16xf32>
    %149 = vector.extract_strided_slice %139 {offsets = [0, 64], sizes = [16, 16], strides = [1, 1]} : vector<16x96xf32> to vector<16x16xf32>
    %150 = vector.extract_strided_slice %147 {offsets = [0, 0], sizes = [8, 16], strides = [1, 1]} : vector<16x16xf32> to vector<8x16xf32>
    %151 = vector.extract_strided_slice %148 {offsets = [0, 0], sizes = [8, 16], strides = [1, 1]} : vector<16x16xf32> to vector<8x16xf32>
    %152 = vector.extract_strided_slice %149 {offsets = [0, 0], sizes = [8, 16], strides = [1, 1]} : vector<16x16xf32> to vector<8x16xf32>
    %cst_131 = arith.constant dense<0.000000e+00> : vector<8x8xf32>
    %153 = tpu.matmul %150, %151, %cst_131 {dimension_numbers = #tpu.dot_dimension_numbers<[1], [1], [0], [0], [0, 0, 1, 0], [], []>} : vector<8x16xf32>, vector<8x16xf32>, vector<8x8xf32> -> vector<8x8xf32>
    %cst_132 = arith.constant 2.500000e-01 : f32
    %154 = vector.broadcast %cst_132 : f32 to vector<8x8xf32>
    %155 = arith.mulf %153, %154 : vector<8x8xf32>
    %156 = arith.addf %155, %145 : vector<8x8xf32>
    %157 = vector.extract_strided_slice %146 {offsets = [0, 0], sizes = [1, 8], strides = [1, 1]} : vector<2x8xf32> to vector<1x8xf32>
    %158 = vector.broadcast %157 : vector<1x8xf32> to vector<8x8xf32>
    %159 = arith.addf %156, %158 : vector<8x8xf32>
    %cst_133 = arith.constant dense<0xFF800000> : vector<8xf32>
    %160 = vector.multi_reduction <maximumf>, %159, %cst_133 [1] : vector<8x8xf32> to vector<8xf32>
    %161 = vector.shape_cast %160 : vector<8xf32> to vector<8x1xf32>
    %162 = vector.broadcast %161 : vector<8x1xf32> to vector<8x8xf32>
    %163 = arith.subf %159, %162 : vector<8x8xf32>
    %164 = math.exp %163 : vector<8x8xf32>
    %cst_134 = arith.constant dense<0.000000e+00> : vector<8xf32>
    %165 = vector.multi_reduction <add>, %164, %cst_134 [1] : vector<8x8xf32> to vector<8xf32>
    %166 = vector.shape_cast %165 : vector<8xf32> to vector<8x1xf32>
    %167 = tpu.reciprocal %166 {approx = true} : vector<8x1xf32> -> vector<8x1xf32>
    %168 = vector.broadcast %167 : vector<8x1xf32> to vector<8x8xf32>
    %169 = arith.mulf %164, %168 : vector<8x8xf32>
    %cst_135 = arith.constant dense<0.000000e+00> : vector<8x16xf32>
    %170 = tpu.matmul %169, %152, %cst_135 {dimension_numbers = #tpu.dot_dimension_numbers<[1], [0], [0], [1], [0, 0, 1, 1], [], []>} : vector<8x8xf32>, vector<8x16xf32>, vector<8x16xf32> -> vector<8x16xf32>
    %c0_136 = arith.constant 0 : index
    %c0_137 = arith.constant 0 : index
    %171 = vector.load %arg23[%c0_136, %c0_137] : memref<16x32xf32, #tpu.memory_space<vmem>>, vector<8x16xf32>
    tpu.vector_store %arg23[%c0_136, %c0_137], %170 {strides = array<i32>} : memref<16x32xf32, #tpu.memory_space<vmem>>, vector<8x16xf32>,
    %172 = vector.extract_strided_slice %147 {offsets = [8, 0], sizes = [8, 16], strides = [1, 1]} : vector<16x16xf32> to vector<8x16xf32>
    %173 = vector.extract_strided_slice %148 {offsets = [8, 0], sizes = [8, 16], strides = [1, 1]} : vector<16x16xf32> to vector<8x16xf32>
    %174 = vector.extract_strided_slice %149 {offsets = [8, 0], sizes = [8, 16], strides = [1, 1]} : vector<16x16xf32> to vector<8x16xf32>
    %cst_138 = arith.constant dense<0.000000e+00> : vector<8x8xf32>
    %175 = tpu.matmul %172, %173, %cst_138 {dimension_numbers = #tpu.dot_dimension_numbers<[1], [1], [0], [0], [0, 0, 1, 0], [], []>} : vector<8x16xf32>, vector<8x16xf32>, vector<8x8xf32> -> vector<8x8xf32>
    %cst_139 = arith.constant 2.500000e-01 : f32
    %176 = vector.broadcast %cst_139 : f32 to vector<8x8xf32>
    %177 = arith.mulf %175, %176 : vector<8x8xf32>
    %178 = arith.addf %177, %145 : vector<8x8xf32>
    %179 = vector.extract_strided_slice %146 {offsets = [1, 0], sizes = [1, 8], strides = [1, 1]} : vector<2x8xf32> to vector<1x8xf32>
    %180 = vector.broadcast %179 : vector<1x8xf32> to vector<8x8xf32>
    %181 = arith.addf %178, %180 : vector<8x8xf32>
    %cst_140 = arith.constant dense<0xFF800000> : vector<8xf32>
    %182 = vector.multi_reduction <maximumf>, %181, %cst_140 [1] : vector<8x8xf32> to vector<8xf32>
    %183 = vector.shape_cast %182 : vector<8xf32> to vector<8x1xf32>
    %184 = vector.broadcast %183 : vector<8x1xf32> to vector<8x8xf32>
    %185 = arith.subf %181, %184 : vector<8x8xf32>
    %186 = math.exp %185 : vector<8x8xf32>
    %cst_141 = arith.constant dense<0.000000e+00> : vector<8xf32>
    %187 = vector.multi_reduction <add>, %186, %cst_141 [1] : vector<8x8xf32> to vector<8xf32>
    %188 = vector.shape_cast %187 : vector<8xf32> to vector<8x1xf32>
    %189 = tpu.reciprocal %188 {approx = true} : vector<8x1xf32> -> vector<8x1xf32>
    %190 = vector.broadcast %189 : vector<8x1xf32> to vector<8x8xf32>
    %191 = arith.mulf %186, %190 : vector<8x8xf32>
    %cst_142 = arith.constant dense<0.000000e+00> : vector<8x16xf32>
    %192 = tpu.matmul %191, %174, %cst_142 {dimension_numbers = #tpu.dot_dimension_numbers<[1], [0], [0], [1], [0, 0, 1, 1], [], []>} : vector<8x8xf32>, vector<8x16xf32>, vector<8x16xf32> -> vector<8x16xf32>
    %c8_143 = arith.constant 8 : index
    %c0_144 = arith.constant 0 : index
    %193 = vector.load %arg23[%c8_143, %c0_144] : memref<16x32xf32, #tpu.memory_space<vmem>>, vector<8x16xf32>
    tpu.vector_store %arg23[%c8_143, %c0_144], %192 {strides = array<i32>} : memref<16x32xf32, #tpu.memory_space<vmem>>, vector<8x16xf32>,
    %194 = vector.extract_strided_slice %139 {offsets = [0, 16], sizes = [16, 16], strides = [1, 1]} : vector<16x96xf32> to vector<16x16xf32>
    %195 = vector.extract_strided_slice %139 {offsets = [0, 48], sizes = [16, 16], strides = [1, 1]} : vector<16x96xf32> to vector<16x16xf32>
    %196 = vector.extract_strided_slice %139 {offsets = [0, 80], sizes = [16, 16], strides = [1, 1]} : vector<16x96xf32> to vector<16x16xf32>
    %197 = vector.extract_strided_slice %194 {offsets = [0, 0], sizes = [8, 16], strides = [1, 1]} : vector<16x16xf32> to vector<8x16xf32>
    %198 = vector.extract_strided_slice %195 {offsets = [0, 0], sizes = [8, 16], strides = [1, 1]} : vector<16x16xf32> to vector<8x16xf32>
    %199 = vector.extract_strided_slice %196 {offsets = [0, 0], sizes = [8, 16], strides = [1, 1]} : vector<16x16xf32> to vector<8x16xf32>
    %cst_145 = arith.constant dense<0.000000e+00> : vector<8x8xf32>
    %200 = tpu.matmul %197, %198, %cst_145 {dimension_numbers = #tpu.dot_dimension_numbers<[1], [1], [0], [0], [0, 0, 1, 0], [], []>} : vector<8x16xf32>, vector<8x16xf32>, vector<8x8xf32> -> vector<8x8xf32>
    %cst_146 = arith.constant 2.500000e-01 : f32
    %201 = vector.broadcast %cst_146 : f32 to vector<8x8xf32>
    %202 = arith.mulf %200, %201 : vector<8x8xf32>
    %203 = arith.addf %202, %145 : vector<8x8xf32>
    %204 = vector.extract_strided_slice %146 {offsets = [0, 0], sizes = [1, 8], strides = [1, 1]} : vector<2x8xf32> to vector<1x8xf32>
    %205 = vector.broadcast %204 : vector<1x8xf32> to vector<8x8xf32>
    %206 = arith.addf %203, %205 : vector<8x8xf32>
    %cst_147 = arith.constant dense<0xFF800000> : vector<8xf32>
    %207 = vector.multi_reduction <maximumf>, %206, %cst_147 [1] : vector<8x8xf32> to vector<8xf32>
    %208 = vector.shape_cast %207 : vector<8xf32> to vector<8x1xf32>
    %209 = vector.broadcast %208 : vector<8x1xf32> to vector<8x8xf32>
    %210 = arith.subf %206, %209 : vector<8x8xf32>
    %211 = math.exp %210 : vector<8x8xf32>
    %cst_148 = arith.constant dense<0.000000e+00> : vector<8xf32>
    %212 = vector.multi_reduction <add>, %211, %cst_148 [1] : vector<8x8xf32> to vector<8xf32>
    %213 = vector.shape_cast %212 : vector<8xf32> to vector<8x1xf32>
    %214 = tpu.reciprocal %213 {approx = true} : vector<8x1xf32> -> vector<8x1xf32>
    %215 = vector.broadcast %214 : vector<8x1xf32> to vector<8x8xf32>
    %216 = arith.mulf %211, %215 : vector<8x8xf32>
    %cst_149 = arith.constant dense<0.000000e+00> : vector<8x16xf32>
    %217 = tpu.matmul %216, %199, %cst_149 {dimension_numbers = #tpu.dot_dimension_numbers<[1], [0], [0], [1], [0, 0, 1, 1], [], []>} : vector<8x8xf32>, vector<8x16xf32>, vector<8x16xf32> -> vector<8x16xf32>
    %c0_150 = arith.constant 0 : index
    %c16 = arith.constant 16 : index
    %218 = vector.load %arg23[%c0_150, %c16] : memref<16x32xf32, #tpu.memory_space<vmem>>, vector<8x16xf32>
    tpu.vector_store %arg23[%c0_150, %c16], %217 {strides = array<i32>} : memref<16x32xf32, #tpu.memory_space<vmem>>, vector<8x16xf32>,
    %219 = vector.extract_strided_slice %194 {offsets = [8, 0], sizes = [8, 16], strides = [1, 1]} : vector<16x16xf32> to vector<8x16xf32>
    %220 = vector.extract_strided_slice %195 {offsets = [8, 0], sizes = [8, 16], strides = [1, 1]} : vector<16x16xf32> to vector<8x16xf32>
    %221 = vector.extract_strided_slice %196 {offsets = [8, 0], sizes = [8, 16], strides = [1, 1]} : vector<16x16xf32> to vector<8x16xf32>
    %cst_151 = arith.constant dense<0.000000e+00> : vector<8x8xf32>
    %222 = tpu.matmul %219, %220, %cst_151 {dimension_numbers = #tpu.dot_dimension_numbers<[1], [1], [0], [0], [0, 0, 1, 0], [], []>} : vector<8x16xf32>, vector<8x16xf32>, vector<8x8xf32> -> vector<8x8xf32>
    %cst_152 = arith.constant 2.500000e-01 : f32
    %223 = vector.broadcast %cst_152 : f32 to vector<8x8xf32>
    %224 = arith.mulf %222, %223 : vector<8x8xf32>
    %225 = arith.addf %224, %145 : vector<8x8xf32>
    %226 = vector.extract_strided_slice %146 {offsets = [1, 0], sizes = [1, 8], strides = [1, 1]} : vector<2x8xf32> to vector<1x8xf32>
    %227 = vector.broadcast %226 : vector<1x8xf32> to vector<8x8xf32>
    %228 = arith.addf %225, %227 : vector<8x8xf32>
    %cst_153 = arith.constant dense<0xFF800000> : vector<8xf32>
    %229 = vector.multi_reduction <maximumf>, %228, %cst_153 [1] : vector<8x8xf32> to vector<8xf32>
    %230 = vector.shape_cast %229 : vector<8xf32> to vector<8x1xf32>
    %231 = vector.broadcast %230 : vector<8x1xf32> to vector<8x8xf32>
    %232 = arith.subf %228, %231 : vector<8x8xf32>
    %233 = math.exp %232 : vector<8x8xf32>
    %cst_154 = arith.constant dense<0.000000e+00> : vector<8xf32>
    %234 = vector.multi_reduction <add>, %233, %cst_154 [1] : vector<8x8xf32> to vector<8xf32>
    %235 = vector.shape_cast %234 : vector<8xf32> to vector<8x1xf32>
    %236 = tpu.reciprocal %235 {approx = true} : vector<8x1xf32> -> vector<8x1xf32>
    %237 = vector.broadcast %236 : vector<8x1xf32> to vector<8x8xf32>
    %238 = arith.mulf %233, %237 : vector<8x8xf32>
    %cst_155 = arith.constant dense<0.000000e+00> : vector<8x16xf32>
    %239 = tpu.matmul %238, %221, %cst_155 {dimension_numbers = #tpu.dot_dimension_numbers<[1], [0], [0], [1], [0, 0, 1, 1], [], []>} : vector<8x8xf32>, vector<8x16xf32>, vector<8x16xf32> -> vector<8x16xf32>
    %c8_156 = arith.constant 8 : index
    %c16_157 = arith.constant 16 : index
    %240 = vector.load %arg23[%c8_156, %c16_157] : memref<16x32xf32, #tpu.memory_space<vmem>>, vector<8x16xf32>
    tpu.vector_store %arg23[%c8_156, %c16_157], %239 {strides = array<i32>} : memref<16x32xf32, #tpu.memory_space<vmem>>, vector<8x16xf32>,
    %c0_158 = arith.constant 0 : index
    %c0_159 = arith.constant 0 : index
    %241 = vector.load %arg23[%c0_158, %c0_159] : memref<16x32xf32, #tpu.memory_space<vmem>>, vector<16x32xf32>
    %c0_160 = arith.constant 0 : index
    %c0_161 = arith.constant 0 : index
    %242 = vector.load %arg9[%c0_160, %c0_161] : memref<32x32xf32, #tpu.memory_space<vmem>>, vector<32x32xf32>
    %cst_162 = arith.constant dense<0.000000e+00> : vector<16x32xf32>
    %243 = tpu.matmul %241, %242, %cst_162 {dimension_numbers = #tpu.dot_dimension_numbers<[1], [0], [0], [1], [0, 0, 1, 1], [], []>} : vector<16x32xf32>, vector<32x32xf32>, vector<16x32xf32> -> vector<16x32xf32>
    %c0_163 = arith.constant 0 : index
    %c0_164 = arith.constant 0 : index
    %244 = vector.load %arg10[%c0_163, %c0_164] : memref<1x32xf32, #tpu.memory_space<vmem>>, vector<1x32xf32>
    %245 = vector.broadcast %244 : vector<1x32xf32> to vector<16x32xf32>
    %246 = arith.addf %243, %245 : vector<16x32xf32>
    %247 = arith.addf %112, %246 : vector<16x32xf32>
    %c0_165 = arith.constant 0 : index
    %c0_166 = arith.constant 0 : index
    %248 = vector.load %arg11[%c0_165, %c0_166] : memref<1x32xf32, #tpu.memory_space<vmem>>, vector<1x32xf32>
    %c0_167 = arith.constant 0 : index
    %c0_168 = arith.constant 0 : index
    %249 = vector.load %arg12[%c0_167, %c0_168] : memref<1x32xf32, #tpu.memory_space<vmem>>, vector<1x32xf32>
    %cst_169 = arith.constant dense<0.000000e+00> : vector<16xf32>
    %250 = vector.multi_reduction <add>, %247, %cst_169 [1] : vector<16x32xf32> to vector<16xf32>
    %251 = vector.shape_cast %250 : vector<16xf32> to vector<16x1xf32>
    %cst_170 = arith.constant 3.200000e+01 : f32
    %252 = vector.broadcast %cst_170 : f32 to vector<16x1xf32>
    %253 = arith.divf %251, %252 : vector<16x1xf32>
    %254 = vector.broadcast %253 : vector<16x1xf32> to vector<16x32xf32>
    %255 = arith.subf %247, %254 : vector<16x32xf32>
    %256 = arith.mulf %255, %255 : vector<16x32xf32>
    %cst_171 = arith.constant dense<0.000000e+00> : vector<16xf32>
    %257 = vector.multi_reduction <add>, %256, %cst_171 [1] : vector<16x32xf32> to vector<16xf32>
    %258 = vector.shape_cast %257 : vector<16xf32> to vector<16x1xf32>
    %cst_172 = arith.constant 3.200000e+01 : f32
    %259 = vector.broadcast %cst_172 : f32 to vector<16x1xf32>
    %260 = arith.divf %258, %259 : vector<16x1xf32>
    %cst_173 = arith.constant 9.99999974E-6 : f32
    %261 = vector.broadcast %cst_173 : f32 to vector<16x1xf32>
    %262 = arith.addf %260, %261 : vector<16x1xf32>
    %263 = math.rsqrt %262 : vector<16x1xf32>
    %264 = vector.broadcast %263 : vector<16x1xf32> to vector<16x32xf32>
    %265 = arith.mulf %255, %264 : vector<16x32xf32>
    %266 = vector.broadcast %248 : vector<1x32xf32> to vector<16x32xf32>
    %267 = arith.mulf %265, %266 : vector<16x32xf32>
    %268 = vector.broadcast %249 : vector<1x32xf32> to vector<16x32xf32>
    %269 = arith.addf %267, %268 : vector<16x32xf32>
    %c0_174 = arith.constant 0 : index
    %c0_175 = arith.constant 0 : index
    %270 = vector.load %arg13[%c0_174, %c0_175] : memref<32x128xf32, #tpu.memory_space<vmem>>, vector<32x128xf32>
    %cst_176 = arith.constant dense<0.000000e+00> : vector<16x128xf32>
    %271 = tpu.matmul %269, %270, %cst_176 {dimension_numbers = #tpu.dot_dimension_numbers<[1], [0], [0], [1], [0, 0, 1, 1], [], []>} : vector<16x32xf32>, vector<32x128xf32>, vector<16x128xf32> -> vector<16x128xf32>
    %c0_177 = arith.constant 0 : index
    %c0_178 = arith.constant 0 : index
    %272 = vector.load %arg14[%c0_177, %c0_178] : memref<1x128xf32, #tpu.memory_space<vmem>>, vector<1x128xf32>
    %273 = vector.broadcast %272 : vector<1x128xf32> to vector<16x128xf32>
    %274 = arith.addf %271, %273 : vector<16x128xf32>
    %275 = arith.mulf %274, %274 : vector<16x128xf32>
    %276 = arith.mulf %274, %275 : vector<16x128xf32>
    %cst_179 = arith.constant 4.471500e-02 : f32
    %277 = vector.broadcast %cst_179 : f32 to vector<16x128xf32>
    %278 = arith.mulf %277, %276 : vector<16x128xf32>
    %279 = arith.addf %274, %278 : vector<16x128xf32>
    %cst_180 = arith.constant 0.797884583 : f32
    %280 = vector.broadcast %cst_180 : f32 to vector<16x128xf32>
    %281 = arith.mulf %280, %279 : vector<16x128xf32>
    %282 = math.tanh %281 : vector<16x128xf32>
    %cst_181 = arith.constant 1.000000e+00 : f32
    %283 = vector.broadcast %cst_181 : f32 to vector<16x128xf32>
    %284 = arith.addf %283, %282 : vector<16x128xf32>
    %cst_182 = arith.constant 5.000000e-01 : f32
    %285 = vector.broadcast %cst_182 : f32 to vector<16x128xf32>
    %286 = arith.mulf %285, %284 : vector<16x128xf32>
    %287 = arith.mulf %274, %286 : vector<16x128xf32>
    %c0_183 = arith.constant 0 : index
    %c0_184 = arith.constant 0 : index
    %288 = vector.load %arg15[%c0_183, %c0_184] : memref<128x32xf32, #tpu.memory_space<vmem>>, vector<128x32xf32>
    %cst_185 = arith.constant dense<0.000000e+00> : vector<16x32xf32>
    %289 = tpu.matmul %287, %288, %cst_185 {dimension_numbers = #tpu.dot_dimension_numbers<[1], [0], [0], [1], [0, 0, 1, 1], [], []>} : vector<16x128xf32>, vector<128x32xf32>, vector<16x32xf32> -> vector<16x32xf32>
    %c0_186 = arith.constant 0 : index
    %c0_187 = arith.constant 0 : index
    %290 = vector.load %arg16[%c0_186, %c0_187] : memref<1x32xf32, #tpu.memory_space<vmem>>, vector<1x32xf32>
    %291 = vector.broadcast %290 : vector<1x32xf32> to vector<16x32xf32>
    %292 = arith.addf %289, %291 : vector<16x32xf32>
    %293 = arith.addf %247, %292 : vector<16x32xf32>
    %c0_188 = arith.constant 0 : index
    %c0_189 = arith.constant 0 : index
    %294 = vector.load %arg17[%c0_188, %c0_189] : memref<1x32xf32, #tpu.memory_space<vmem>>, vector<1x32xf32>
    %c0_190 = arith.constant 0 : index
    %c0_191 = arith.constant 0 : index
    %295 = vector.load %arg18[%c0_190, %c0_191] : memref<1x32xf32, #tpu.memory_space<vmem>>, vector<1x32xf32>
    %cst_192 = arith.constant dense<0.000000e+00> : vector<16xf32>
    %296 = vector.multi_reduction <add>, %293, %cst_192 [1] : vector<16x32xf32> to vector<16xf32>
    %297 = vector.shape_cast %296 : vector<16xf32> to vector<16x1xf32>
    %cst_193 = arith.constant 3.200000e+01 : f32
    %298 = vector.broadcast %cst_193 : f32 to vector<16x1xf32>
    %299 = arith.divf %297, %298 : vector<16x1xf32>
    %300 = vector.broadcast %299 : vector<16x1xf32> to vector<16x32xf32>
    %301 = arith.subf %293, %300 : vector<16x32xf32>
    %302 = arith.mulf %301, %301 : vector<16x32xf32>
    %cst_194 = arith.constant dense<0.000000e+00> : vector<16xf32>
    %303 = vector.multi_reduction <add>, %302, %cst_194 [1] : vector<16x32xf32> to vector<16xf32>
    %304 = vector.shape_cast %303 : vector<16xf32> to vector<16x1xf32>
    %cst_195 = arith.constant 3.200000e+01 : f32
    %305 = vector.broadcast %cst_195 : f32 to vector<16x1xf32>
    %306 = arith.divf %304, %305 : vector<16x1xf32>
    %cst_196 = arith.constant 9.99999974E-6 : f32
    %307 = vector.broadcast %cst_196 : f32 to vector<16x1xf32>
    %308 = arith.addf %306, %307 : vector<16x1xf32>
    %309 = math.rsqrt %308 : vector<16x1xf32>
    %310 = vector.broadcast %309 : vector<16x1xf32> to vector<16x32xf32>
    %311 = arith.mulf %301, %310 : vector<16x32xf32>
    %312 = vector.broadcast %294 : vector<1x32xf32> to vector<16x32xf32>
    %313 = arith.mulf %311, %312 : vector<16x32xf32>
    %314 = vector.broadcast %295 : vector<1x32xf32> to vector<16x32xf32>
    %315 = arith.addf %313, %314 : vector<16x32xf32>
    %c0_197 = arith.constant 0 : index
    %c0_198 = arith.constant 0 : index
    %316 = vector.load %arg19[%c0_197, %c0_198] : memref<32x128xf32, #tpu.memory_space<vmem>>, vector<32x128xf32>
    %cst_199 = arith.constant dense<0.000000e+00> : vector<16x128xf32>
    %317 = tpu.matmul %315, %316, %cst_199 {dimension_numbers = #tpu.dot_dimension_numbers<[1], [0], [0], [1], [0, 0, 1, 1], [], []>} : vector<16x32xf32>, vector<32x128xf32>, vector<16x128xf32> -> vector<16x128xf32>
    %c0_200 = arith.constant 0 : index
    %c0_201 = arith.constant 0 : index
    %318 = vector.load %arg20[%c0_200, %c0_201] : memref<1x128xf32, #tpu.memory_space<vmem>>, vector<1x128xf32>
    %319 = vector.broadcast %318 : vector<1x128xf32> to vector<16x128xf32>
    %320 = arith.addf %317, %319 : vector<16x128xf32>
    %c0_202 = arith.constant 0 : index
    %c0_203 = arith.constant 0 : index
    %321 = vector.load %arg21[%c0_202, %c0_203] : memref<16x128xf32, #tpu.memory_space<vmem>>, vector<16x128xf32>
    tpu.vector_store %arg21[%c0_202, %c0_203], %320 {strides = array<i32>} : memref<16x128xf32, #tpu.memory_space<vmem>>, vector<16x128xf32>,
    return
  }
  func.func @transform_0(%arg0: i32, %arg1: memref<2x8xi32, #tpu.memory_space<smem>>) -> (i32, i32, i32) {
    %c0_i32 = arith.constant 0 : i32
    %c0_i32_0 = arith.constant 0 : i32
    %c0_i32_1 = arith.constant 0 : i32
    %c0_i32_2 = arith.constant 0 : i32
    return %c0_i32, %c0_i32_0, %c0_i32_1 : i32, i32, i32
  }
  func.func @transform_1(%arg0: i32, %arg1: memref<2x8xi32, #tpu.memory_space<smem>>) -> (i32, i32) {
    %c0_i32 = arith.constant 0 : i32
    %c0_i32_0 = arith.constant 0 : i32
    %c0_i32_1 = arith.constant 0 : i32
    return %c0_i32, %c0_i32_0 : i32, i32
  }
  func.func @transform_2(%arg0: i32, %arg1: memref<2x8xi32, #tpu.memory_space<smem>>) -> (i32, i32) {
    %c0_i32 = arith.constant 0 : i32
    %c0_i32_0 = arith.constant 0 : i32
    %c0_i32_1 = arith.constant 0 : i32
    return %c0_i32, %c0_i32_0 : i32, i32
  }
  func.func @transform_3(%arg0: i32, %arg1: memref<2x8xi32, #tpu.memory_space<smem>>) -> (i32, i32) {
    %c0_i32 = arith.constant 0 : i32
    %c0_i32_0 = arith.constant 0 : i32
    %c0_i32_1 = arith.constant 0 : i32
    return %c0_i32, %c0_i32_0 : i32, i32
  }
  func.func @transform_4(%arg0: i32, %arg1: memref<2x8xi32, #tpu.memory_space<smem>>) -> (i32, i32) {
    %c0_i32 = arith.constant 0 : i32
    %c0_i32_0 = arith.constant 0 : i32
    %c0_i32_1 = arith.constant 0 : i32
    return %c0_i32, %c0_i32_0 : i32, i32
  }
  func.func @transform_5(%arg0: i32, %arg1: memref<2x8xi32, #tpu.memory_space<smem>>) -> (i32, i32) {
    %c0_i32 = arith.constant 0 : i32
    %c0_i32_0 = arith.constant 0 : i32
    %c0_i32_1 = arith.constant 0 : i32
    return %c0_i32, %c0_i32_0 : i32, i32
  }
  func.func @transform_6(%arg0: i32, %arg1: memref<2x8xi32, #tpu.memory_space<smem>>) -> (i32, i32) {
    %c0_i32 = arith.constant 0 : i32
    %c0_i32_0 = arith.constant 0 : i32
    %c0_i32_1 = arith.constant 0 : i32
    return %c0_i32, %c0_i32_0 : i32, i32
  }
  func.func @transform_7(%arg0: i32, %arg1: memref<2x8xi32, #tpu.memory_space<smem>>) -> (i32, i32) {
    %c0_i32 = arith.constant 0 : i32
    %c0_i32_0 = arith.constant 0 : i32
    %c0_i32_1 = arith.constant 0 : i32
    return %c0_i32, %c0_i32_0 : i32, i32
  }
  func.func @transform_8(%arg0: i32, %arg1: memref<2x8xi32, #tpu.memory_space<smem>>) -> (i32, i32) {
    %c0_i32 = arith.constant 0 : i32
    %c0_i32_0 = arith.constant 0 : i32
    %c0_i32_1 = arith.constant 0 : i32
    return %c0_i32, %c0_i32_0 : i32, i32
  }
  func.func @transform_9(%arg0: i32, %arg1: memref<2x8xi32, #tpu.memory_space<smem>>) -> (i32, i32) {
    %c0_i32 = arith.constant 0 : i32
    %c0_i32_0 = arith.constant 0 : i32
    %c0_i32_1 = arith.constant 0 : i32
    return %c0_i32, %c0_i32_0 : i32, i32
  }
  func.func @transform_10(%arg0: i32, %arg1: memref<2x8xi32, #tpu.memory_space<smem>>) -> (i32, i32) {
    %c0_i32 = arith.constant 0 : i32
    %c0_i32_0 = arith.constant 0 : i32
    %c0_i32_1 = arith.constant 0 : i32
    return %c0_i32, %c0_i32_0 : i32, i32
  }
  func.func @transform_11(%arg0: i32, %arg1: memref<2x8xi32, #tpu.memory_space<smem>>) -> (i32, i32) {
    %c0_i32 = arith.constant 0 : i32
    %c0_i32_0 = arith.constant 0 : i32
    %c0_i32_1 = arith.constant 0 : i32
    return %c0_i32, %c0_i32_0 : i32, i32
  }
  func.func @transform_12(%arg0: i32, %arg1: memref<2x8xi32, #tpu.memory_space<smem>>) -> (i32, i32) {
    %c0_i32 = arith.constant 0 : i32
    %c0_i32_0 = arith.constant 0 : i32
    %c0_i32_1 = arith.constant 0 : i32
    return %c0_i32, %c0_i32_0 : i32, i32
  }
  func.func @transform_13(%arg0: i32, %arg1: memref<2x8xi32, #tpu.memory_space<smem>>) -> (i32, i32) {
    %c0_i32 = arith.constant 0 : i32
    %c0_i32_0 = arith.constant 0 : i32
    %c0_i32_1 = arith.constant 0 : i32
    return %c0_i32, %c0_i32_0 : i32, i32
  }
  func.func @transform_14(%arg0: i32, %arg1: memref<2x8xi32, #tpu.memory_space<smem>>) -> (i32, i32) {
    %c0_i32 = arith.constant 0 : i32
    %c0_i32_0 = arith.constant 0 : i32
    %c0_i32_1 = arith.constant 0 : i32
    return %c0_i32, %c0_i32_0 : i32, i32
  }
  func.func @transform_15(%arg0: i32, %arg1: memref<2x8xi32, #tpu.memory_space<smem>>) -> (i32, i32) {
    %c0_i32 = arith.constant 0 : i32
    %c0_i32_0 = arith.constant 0 : i32
    %c0_i32_1 = arith.constant 0 : i32
    return %c0_i32, %c0_i32_0 : i32, i32
  }
  func.func @transform_16(%arg0: i32, %arg1: memref<2x8xi32, #tpu.memory_space<smem>>) -> (i32, i32) {
    %c0_i32 = arith.constant 0 : i32
    %c0_i32_0 = arith.constant 0 : i32
    %c0_i32_1 = arith.constant 0 : i32
    return %c0_i32, %c0_i32_0 : i32, i32
  }
  func.func @transform_17(%arg0: i32, %arg1: memref<2x8xi32, #tpu.memory_space<smem>>) -> (i32, i32) {
    %c0_i32 = arith.constant 0 : i32
    %c0_i32_0 = arith.constant 0 : i32
    %c0_i32_1 = arith.constant 0 : i32
    return %c0_i32, %c0_i32_0 : i32, i32
  }
  func.func @transform_18(%arg0: i32, %arg1: memref<2x8xi32, #tpu.memory_space<smem>>) -> (i32, i32) {
    %c0_i32 = arith.constant 0 : i32
    %c0_i32_0 = arith.constant 0 : i32
    %c0_i32_1 = arith.constant 0 : i32
    return %c0_i32, %c0_i32_0 : i32, i32
  }
  func.func @transform_19(%arg0: i32, %arg1: memref<2x8xi32, #tpu.memory_space<smem>>) -> (i32, i32) {
    %c0_i32 = arith.constant 0 : i32
    %c0_i32_0 = arith.constant 0 : i32
    %c0_i32_1 = arith.constant 0 : i32
    return %c0_i32, %c0_i32_0 : i32, i32
  }
}

</mosaic_0001>

<bundles_post_ra>
// kernel: policy_with_value_head.1
= control target key start
LH: loop header
LB: loop body
LE: loop exit
PB: predicated region body
PF: predicated region fallthrough
CT: control target
= control target key end

     0   :  { %s2364_s0 = inlined_call_operand.vmem [shape: s32[2,8], index: 0, kind: input, shape index: {}]   ;;  %s2365_s1 = inlined_call_operand.vmem [shape: f32[64,1,32], index: 1, kind: input, shape index: {}]   ;;  %s2366_s2 = inlined_call_operand.vmem [shape: f32[8,32], index: 2, kind: input, shape index: {}]   ;;  %s2367_s3 = inlined_call_operand.vmem [shape: f32[2,8], index: 3, kind: input, shape index: {}]   ;;  %s2368_s4 = inlined_call_operand.vmem [shape: f32[1,32], index: 4, kind: input, shape index: {}]   ;;  %s2369_s5 = inlined_call_operand.vmem [shape: f32[1,32], index: 5, kind: input, shape index: {}]   ;;  %s2370_s6 = inlined_call_operand.vmem [shape: f32[32,96], index: 6, kind: input, shape index: {}]   ;;  %s2371_s7 = inlined_call_operand.vmem [shape: f32[1,96], index: 7, kind: input, shape index: {}]   ;;  %s2372_s8 = inlined_call_operand.vmem [shape: f32[32,32], index: 8, kind: input, shape index: {}]   ;;  %s2373_s9 = inlined_call_operand.vmem [shape: f32[1,32], index: 9, kind: input, shape index: {}]   ;;  %s2374_s10 = inlined_call_operand.vmem [shape: f32[1,32], index: 10, kind: input, shape index: {}]   ;;  %s2375_s11 = inlined_call_operand.vmem [shape: f32[1,32], index: 11, kind: input, shape index: {}]   ;;  %s2376_s12 = inlined_call_operand.vmem [shape: f32[32,128], index: 12, kind: input, shape index: {}]   ;;  %s2377_s13 = inlined_call_operand.vmem [shape: f32[1,128], index: 13, kind: input, shape index: {}]   ;;  %s2378_s14 = inlined_call_operand.vmem [shape: f32[128,32], index: 14, kind: input, shape index: {}]   ;;  %s2379_s15 = inlined_call_operand.vmem [shape: f32[1,32], index: 15, kind: input, shape index: {}]   ;;  %s2380_s16 = inlined_call_operand.vmem [shape: f32[1,32], index: 16, kind: input, shape index: {}]   ;;  %s2381_s17 = inlined_call_operand.vmem [shape: f32[1,32], index: 17, kind: input, shape index: {}]   ;;  %s2382_s18 = inlined_call_operand.vmem [shape: f32[32,128], index: 18, kind: input, shape index: {}]   ;;  %s2383_s19 = inlined_call_operand.vmem [shape: f32[1,128], index: 19, kind: input, shape index: {}]   ;;  %s2384_s20 = inlined_call_operand.vmem [shape: f32[16,128], index: 20, kind: output, shape index: {}]  }
   0x1   :  { %2390 = sst [smem:[#allocation7_spill]] %s2364_s0 }
   0x2   :  { %2391 = sst [smem:[#allocation8_spill]] %s2365_s1  ;;  %s2403_s23 = sld [smem:[#allocation7_spill]] }
   0x3   :  { %2392 = sst [smem:[#allocation9_spill]] %s2366_s2 }
   0x4   :  { %2393 = sst [smem:[#allocation10_spill]] %s2367_s3 }
   0x5   :  { %2394 = sst [smem:[#allocation11_spill]] %s2368_s4 }
   0x6   :  { %2395 = sst [smem:[#allocation12_spill]] %s2377_s13 }
   0x7   :  { %2396 = sst [smem:[#allocation13_spill]] %s2378_s14 }
   0x8   :  { %2397 = sst [smem:[#allocation14_spill]] %s2379_s15  ;;  %s25_s13 = sshll.u32 %s2403_s23, 4  ;;  %s26_s13 = int_to_ptr.vmem [resolvable:$true] %s25_s13 }
   0x9   :  { %2398 = sst [smem:[#allocation15_spill]] %s2380_s16  ;;  %s1843_s24 = scalar_lea.vmem %s26_s13, 32 }
   0xa   :  { %2399 = sst [smem:[#allocation16_spill]] %s2381_s17  ;;  %p1844_p0 = scmp.ne.s32.totalorder %s26_s13, %s1843_s24 }
   0xb   :  { %2400 = sst [smem:[#allocation17_spill]] %s2382_s18  ;;  %p1848_p1 = scmp.lt.s32.totalorder %s26_s13, %s26_s13 }
   0xc   :  { %2401 = sst [smem:[#allocation18_spill]] %s2383_s19  ;;  %p1849_p2 = scmp.lt.s32.totalorder %s1843_s24, %s1843_s24 }
   0xd   :  { %2402 = sst [smem:[#allocation19_spill]] %s2384_s20 }
   0xe   :  { %p1850_p3 = por %p1849_p2, %p1848_p1 }
  0x10   :  { %p1851_p4 = pnand %p1850_p3, %p1844_p0 }
  0x12   :  { %1854 = shalt.err (!%p1851_p4)  }
  0x13   :  { %s1857_s2 = smov [#allocation5]  }
  0x14   :  { %28 = dma.vmem_to_smem %s26_s13, 32, %s1857_s2, [#allocation4] }
  0x15   :  { %1855 = dma.done.wait [#allocation4], 32 }
  0x16   :  { %1856 = vsyncadd [#allocation4], 4294967264 }
  0x17   :  { %30 = sfence }
  0x18   :  { %s69_s25 = sld [smem:[#allocation5]]  ;;  %s1514_s3 = sld [smem:[#allocation5 + $0x1]]  ;;  %vm74_vm0 = vcmask 253952   ;;  %vm170_vm1 = vcmask 261120   ;;  %v214_v62 = vld [vmem:[%s2370_s6] sm:$0xff]  ;;  %v215_v63 = vld [vmem:[%s2370_s6 + $0x8] sm:$0xff] }
  0x19   :  { %s1515_s26 = sld [smem:[#allocation5 + $0x2]]  ;;  %s1516_s27 = sld [smem:[#allocation5 + $0x3]]  ;;  %vm1859_vm2 = vmmov 0   ;;  %vm316_vm3 = vcmask 130048   ;;  %vm398_vm5 = vcmask 64512   ;;  %vm831_vm6 = vcmask 261248  }
  0x1a   :  { %s2404_s29 = sld [smem:[#allocation9_spill]]  ;;  %s1978_s30 = sld [smem:[#allocation5 + $0x4]] }
  0x1b   :  { %s1980_s0 = sld [smem:[#allocation5 + $0x5]]  ;;  %s1985_s13 = sld [smem:[#allocation5 + $0x6]] }
  0x1c   :  { %s1990_s24 = sld [smem:[#allocation5 + $0x7]]  ;;  %s1992_s2 = sld [smem:[#allocation5 + $0x80]] }
  0x1d   :  { %s2405_s20 = sld [smem:[#allocation8_spill]]  ;;  %s2041_s1 = sld [smem:[#allocation5 + $0x83]] }
  0x1e   :  { %s2003_s22 = sld [smem:[#allocation5 + $0x81]]  ;;  %s1525_s17 = sld [smem:[#allocation5 + $0x84]] }
  0x1f   :  { %s1527_s21 = sld [smem:[#allocation5 + $0x86]] }
  0x20   :  { %v72_v0 = vld [vmem:[%s2404_s29] sm:$0x1]  ;;  %v79_v1 = vld [vmem:[%s2404_s29 + $0x1] sm:$0x1]  ;;  %v85_v2 = vld [vmem:[%s2404_s29 + $0x2] sm:$0x1] }
  0x21   :  { %v91_v3 = vld [vmem:[%s2404_s29 + $0x3] sm:$0x1]  ;;  %v97_v4 = vld [vmem:[%s2404_s29 + $0x4] sm:$0x1]  ;;  %v103_v6 = vld [vmem:[%s2404_s29 + $0x5] sm:$0x1] }
  0x22   :  { %v109_v7 = vld [vmem:[%s2404_s29 + $0x6] sm:$0x1]  ;;  %v115_v14 = vld [vmem:[%s2404_s29 + $0x7] sm:$0x1]  ;;  %v121_v15 = vld [vmem:[%s2404_s29] sm:$0x1] }
  0x23   :  { %s70_s19 = scalar_lea.vmem %s2405_s20, %s69_s25  ;;  %s77_s15 = scalar_lea.vmem %s2405_s20, %s1514_s3  ;;  %v127_v22 = vld [vmem:[%s2404_s29 + $0x1] sm:$0x1]  ;;  %v133_v23 = vld [vmem:[%s2404_s29 + $0x2] sm:$0x1]  ;;  %v139_v32 = vld [vmem:[%s2404_s29 + $0x3] sm:$0x1] }
  0x24   :  { %v71_v5 = vld [vmem:[%s70_s19] sm:$0x1]  ;;  %s83_s25 = scalar_lea.vmem %s2405_s20, %s1515_s26  ;;  %s89_s18 = scalar_lea.vmem %s2405_s20, %s1516_s27  ;;  %v145_v35 = vld [vmem:[%s2404_s29 + $0x4] sm:$0x1]  ;;  %v151_v37 = vld [vmem:[%s2404_s29 + $0x5] sm:$0x1] }
  0x25   :  { %v73_v8 = vadd.f32 %v72_v0, %v71_v5  ;;  %v78_v9 = vld [vmem:[%s77_s15] sm:$0x1]  ;;  %s2020_s3 = sld [smem:[#allocation5 + $0x82]]  ;;  %s95_s23 = scalar_lea.vmem %s2405_s20, %s1978_s30  ;;  %v157_v38 = vld [vmem:[%s2404_s29 + $0x6] sm:$0x1]  ;;  %v216_v0 = vld [vmem:[%s2370_s6 + $0x10] sm:$0xff] }
  0x26   :  { %v84_v10 = vld [vmem:[%s83_s25] sm:$0x1]  ;;  %v80_v11 = vadd.f32 %v79_v1, %v78_v9  ;;  %s101_s15 = scalar_lea.vmem %s2405_s20, %s1980_s0  ;;  %s107_s19 = scalar_lea.vmem %s2405_s20, %s1985_s13  ;;  %v163_v40 = vld [vmem:[%s2404_s29 + $0x7] sm:$0x1]  ;;  %v1737_v1 = vpack.c.bf16 %v215_v63, %v214_v62 }
  0x27   :  { %v86_v12 = vadd.f32 %v85_v2, %v84_v10  ;;  %v90_v13 = vld [vmem:[%s89_s18] sm:$0x1]  ;;  %75 = vst.msk [vmem:[#allocation2] sm:$0x1] %vm74_vm0, %v73_v8  ;;  %s113_s14 = scalar_lea.vmem %s2405_s20, %s1990_s24  ;;  %s119_s28 = scalar_lea.vmem %s2405_s20, %s1992_s2  ;;  %v217_v2 = vld [vmem:[%s2370_s6 + $0x18] sm:$0xff] }
  0x28   :  { %v92_v16 = vadd.f32 %v91_v3, %v90_v13  ;;  %v96_v17 = vld [vmem:[%s95_s23] sm:$0x1]  ;;  %81 = vst.msk [vmem:[#allocation2 + $0x1] sm:$0x1] %vm74_vm0, %v80_v11  ;;  %s125_s27 = scalar_lea.vmem %s2405_s20, %s2003_s22  ;;  %s1526_s2 = sld [smem:[#allocation5 + $0x85]]  ;;  %v1741_v3 = vpack.c.bf16 %v217_v2, %v216_v0  ;;  %1738 = vmatprep.subr.bf16.mxu1 %v1737_v1 }
  0x29   :  { %v102_v18 = vld [vmem:[%s101_s15] sm:$0x1]  ;;  %87 = vst.msk [vmem:[#allocation2 + $0x2] sm:$0x1] %vm74_vm0, %v86_v12  ;;  %v98_v19 = vadd.f32 %v97_v4, %v96_v17  ;;  %s1528_s18 = sld [smem:[#allocation5 + $0x87]]  ;;  %s143_s25 = scalar_lea.vmem %s2405_s20, %s1525_s17  ;;  %1740 = vmatpush3.bf16.msra.mxu1 %v1737_v1 }
  0x2a   :  { %v104_v20 = vadd.f32 %v103_v6, %v102_v18  ;;  %v108_v21 = vld [vmem:[%s107_s19] sm:$0x1]  ;;  %93 = vst.msk [vmem:[#allocation2 + $0x3] sm:$0x1] %vm74_vm0, %v92_v16  ;;  %s155_s26 = scalar_lea.vmem %s2405_s20, %s1527_s21  ;;  %1742 = vmatprep.subr.bf16.mxu1 %v1741_v3  ;;  %s1860_s19 = smov 96  }
  0x2b   :  { %v110_v24 = vadd.f32 %v109_v7, %v108_v21  ;;  %v114_v25 = vld [vmem:[%s113_s14] sm:$0x1]  ;;  %99 = vst.msk [vmem:[#allocation2 + $0x4] sm:$0x1] %vm74_vm0, %v98_v19  ;;  %s131_s0 = scalar_lea.vmem %s2405_s20, %s2020_s3  ;;  %s2407_s14 = sld [smem:[#allocation10_spill]] }
  0x2c   :  { %v120_v26 = vld [vmem:[%s119_s28] sm:$0x1]  ;;  %105 = vst.msk [vmem:[#allocation2 + $0x5] sm:$0x1] %vm74_vm0, %v104_v20  ;;  %v116_v27 = vadd.f32 %v115_v14, %v114_v25  ;;  %s137_s28 = scalar_lea.vmem %s2405_s20, %s2041_s1  ;;  %v1858_v20 = vmov 0.0   ;;  %s1864_s23 = smov 80  }
  0x2d   :  { %v122_v28 = vadd.f32 %v121_v15, %v120_v26  ;;  %v126_v29 = vld [vmem:[%s125_s27] sm:$0x1]  ;;  %111 = vst.msk [vmem:[#allocation2 + $0x6] sm:$0x1] %vm74_vm0, %v110_v24  ;;  %1744 = vmatpush3.bf16.msra.mxu1 %v1741_v3  ;;  %s2406_s27 = sld [smem:[#allocation11_spill]]  ;;  %1649 = vmatprep.subr.mxu0 %v1858_v20  ;;  %s1866_s15 = smov 16  }
  0x2e   :  { %v128_v30 = vadd.f32 %v127_v22, %v126_v29  ;;  %117 = vst.msk [vmem:[#allocation2 + $0x7] sm:$0x1] %vm74_vm0, %v116_v27  ;;  %v132_v31 = vld [vmem:[%s131_s0] sm:$0x1]  ;;  %s149_s0 = scalar_lea.vmem %s2405_s20, %s1526_s2  ;;  %1629 = vmatprep.subr.mxu1 %v1858_v20  ;;  %1651 = vmatprep.mubr.msk.f32.mxu0 %vm1859_vm2, %v1858_v20  ;;  %v306_v27 = vlaneseq  ;;  %s2413_s24 = sld [smem:[#allocation16_spill]] }
  0x2f   :  { %123 = vst.msk [vmem:[#allocation2 + $0x8] sm:$0x1] %vm74_vm0, %v122_v28  ;;  %v134_v33 = vadd.f32 %v133_v23, %v132_v31  ;;  %v138_v34 = vld [vmem:[%s137_s28] sm:$0x1]  ;;  %s161_s3 = scalar_lea.vmem %s2405_s20, %s1528_s18  ;;  %s1865_s28 = smov 48  }
  0x30   :  { %129 = vst.msk [vmem:[#allocation2 + $0x9] sm:$0x1] %vm74_vm0, %v128_v30  ;;  %v140_v36 = vadd.f32 %v139_v32, %v138_v34  ;;  %v144_v39 = vld [vmem:[%s143_s25] sm:$0x1]  ;;  %v2166_v28 = vshrl.u32 %v306_v27, 7  ;;  %v309_v29 = vand.u32 127, %v306_v27 }
  0x31   :  { %135 = vst.msk [vmem:[#allocation2 + $0xa] sm:$0x1] %vm74_vm0, %v134_v33  ;;  %v146_v41 = vadd.f32 %v145_v35, %v144_v39  ;;  %v150_v42 = vld [vmem:[%s149_s0] sm:$0x1]  ;;  %s1861_s0 = smov 112   ;;  %s2414_s30 = sld [smem:[#allocation18_spill]] }
  0x32   :  { %141 = vst.msk [vmem:[#allocation2 + $0xb] sm:$0x1] %vm74_vm0, %v140_v36  ;;  %v156_v43 = vld [vmem:[%s155_s26] sm:$0x1]  ;;  %v152_v44 = vadd.f32 %v151_v37, %v150_v42  ;;  %vm310_vm4 = vcmp.le.s32.totalorder %v309_v29, %v2166_v28  ;;  %v395_v30 = vsub.s32 0, %v2166_v28  ;;  %s1863_s26 = smov 64  }
  0x33   :  { %v158_v45 = vadd.f32 %v157_v38, %v156_v43  ;;  %v162_v46 = vld [vmem:[%s161_s3] sm:$0x1]  ;;  %147 = vst.msk [vmem:[#allocation2 + $0xc] sm:$0x1] %vm74_vm0, %v146_v41  ;;  %v1862_v32 = vmov -1e+30  }
  0x34   :  { %v164_v48 = vadd.f32 %v163_v40, %v162_v46  ;;  %153 = vst.msk [vmem:[#allocation2 + $0xd] sm:$0x1] %vm74_vm0, %v152_v44  ;;  %v1529_v11 = vld [vmem:[%s2406_s27] ss:$0 sm:$0xff]  ;;  %v2173_v33 = vsel %vm310_vm4, 0.0, %v1862_v32  ;;  %v568_v0 = vsub.s32 1, %v2166_v28 }
  0x35   :  { %v2107_v47 = vld [vmem:[#allocation2] sm:$0xff]  ;;  %159 = vst.msk [vmem:[#allocation2 + $0xe] sm:$0x1] %vm74_vm0, %v158_v45  ;;  %s2411_s3 = sld [smem:[#allocation17_spill]] }
  0x36   :  { %v171_v49 = vsel %vm170_vm1, %v2107_v47, 0.0  ;;  %165 = vst.msk [vmem:[#allocation2 + $0xf] sm:$0x1] %vm74_vm0, %v164_v48  ;;  %v1530_v13 = vld [vmem:[%s2369_s5] ss:$0 sm:$0xff] }
  0x37   :  { %172 = vadd.xlane.f32.xlu0 %v171_v49  ;;  %v1531_v21 = vld [vmem:[%s2371_s7] ss:$0 sm:$0xff] }
  0x38   :  { %v312_v31 = vld [vmem:[%s2407_s14] sm:$0x3]  ;;  %s2408_s14 = sld [smem:[#allocation13_spill]] }
  0x39   :  { %v396_v37 = vrot.slane %v312_v31, %v395_v30 }
  0x3d   :  { %v2115_v50 = vld [vmem:[#allocation2 + $0x8] sm:$0xff] }
  0x3e   :  { %v174_v51 = vsel %vm170_vm1, %v2115_v50, 0.0 }
  0x3f   :  { %175 = vadd.xlane.f32.xlu0 %v174_v51 }
  0xc4   :  { %v173_v52 = vpop.xlane.xlu0 %172 }
  0xc5   :  { %v178_v53 = vmul.f32 0.03125, %v173_v52 }
  0xc7   :  { %v180_v54 = vsub.f32 %v2107_v47, %v178_v53 }
  0xc9   :  { %v182_v55 = vmul.f32 %v180_v54, %v180_v54 }
  0xcb   :  { %v184_v56 = vsel %vm170_vm1, %v182_v55, 0.0 }
  0xcc   :  { %185 = vadd.xlane.f32.xlu1 %v184_v56  ;;  %v176_v57 = vpop.xlane.xlu0 %175 }
  0xcd   :  { %v179_v58 = vmul.f32 0.03125, %v176_v57 }
  0xcf   :  { %v181_v59 = vsub.f32 %v2115_v50, %v179_v58 }
  0xd1   :  { %v183_v60 = vmul.f32 %v181_v59, %v181_v59 }
  0xd3   :  { %v187_v61 = vsel %vm170_vm1, %v183_v60, 0.0 }
  0xd4   :  { %188 = vadd.xlane.f32.xlu1 %v187_v61 }
 0x159   :  { %v186_v4 = vpop.xlane.xlu1 %185 }
 0x15a   :  { %v190_v5 = vmul.f32 0.03125, %v186_v4 }
 0x15c   :  { %v192_v6 = vadd.f32 1e-05, %v190_v5  ;;  %v569_v5 = vrot.slane %v312_v31, %v568_v0 }
 0x15e   :  { %1811 = vrsqrt.f32 %v192_v6 }
 0x161   :  { %v189_v7 = vpop.xlane.xlu1 %188 }
 0x162   :  { %v191_v8 = vmul.f32 0.03125, %v189_v7 }
 0x164   :  { %v193_v9 = vadd.f32 1e-05, %v191_v8 }
 0x166   :  { %1813 = vrsqrt.f32 %v193_v9 }
 0x168   :  { %v1812_v10 = vpop.eup %1811 }
 0x169   :  { %v196_v12 = vmul.f32 %v1812_v10, %v180_v54 }
 0x16b   :  { %v204_v14 = vmul.f32 %v1529_v11, %v196_v12 }
 0x16d   :  { %v212_v15 = vadd.f32 %v1530_v13, %v204_v14 }
 0x16f   :  { %1626 = vmatprep.mubr.msk.f32.mxu1 %vm170_vm1, %v212_v15 }
 0x170   :  { %v1814_v16 = vpop.eup %1813 }
 0x171   :  { %v197_v17 = vmul.f32 %v1814_v16, %v181_v59 }
 0x173   :  { %v205_v18 = vmul.f32 %v1529_v11, %v197_v17 }
 0x175   :  { %v213_v19 = vadd.f32 %v1530_v13, %v205_v18 }
 0x177   :  { %1627 = vmatmul.mubr.msk.f32.vlgmr.msra.gmra.mrb[0].mxu1 %vm170_vm1, %v213_v19 }
 0x178   :  { %1631 = vmatprep.mubr.msk.f32.mxu1 %vm1859_vm2, %v1858_v20 }
 0x24a   :  { %v1628_v22 = vpop.f32.mrb[0].mxu1 }
 0x24b   :  { %v297_v23 = vpop.f32.mrb[1].mxu1  ;;  %v2155_v25 = vadd.f32 %v1628_v22, %v1531_v21 }
 0x24c   :  { %v2152_v24 = vadd.f32 %v1531_v21, %v297_v23 }
 0x24e   :  { %314 = vrot.lane.b32.xlu0 %v2152_v24, %s1860_s19 }
 0x252   :  { %488 = vrot.lane.b32.xlu0 %v2155_v25, %s1860_s19  ;;  %s2415_s19 = sld [smem:[#allocation19_spill]] }
 0x256   :  { %659 = vrot.lane.b32.xlu0 %v2152_v24, %s1861_s0 }
 0x25a   :  { %833 = vrot.lane.b32.xlu0 %v2155_v25, %s1861_s0 }
 0x2c0   :  { %v315_v26 = vpop.permute.xlu0 %314 }
 0x2c1   :  { %1630 = vmatpush3.xpose.msk.msra.mxu1 %vm316_vm3, %v315_v26 }
 0x2c2   :  { %1634 = vmatprep.subr.mxu1 %v1858_v20 }
 0x2c4   :  { %1632 = vmatmul.mubr.msk.f32.vlgmr.msra.gmra.mrb[2].mxu1 %vm316_vm3, %v2152_v24  ;;  %v489_v45 = vpop.permute.xlu0 %488 }
 0x2c5   :  { %1636 = vmatprep.mubr.msk.f32.mxu1 %vm1859_vm2, %v1858_v20 }
 0x2c8   :  { %v660_v48 = vpop.permute.xlu0 %659 }
 0x2cc   :  { %v834_v54 = vpop.permute.xlu0 %833 }
 0x397   :  { %v387_v34 = vpop.f32.mrb[2].mxu1 }
 0x398   :  { %v391_v35 = vmul.f32 0.25, %v387_v34  ;;  %v1633_v36 = vpop.f32.mrb[3].mxu1 }
 0x39a   :  { %v392_v38 = vadd.f32 %v391_v35, %v2173_v33 }
 0x39c   :  { %v397_v39 = vadd.f32 %v396_v37, %v392_v38 }
 0x39e   :  { %v399_v40 = vsel %vm398_vm5, %v397_v39, -inf }
 0x39f   :  { %400 = vmax.xlane.f32.xlu1 %v399_v40 }
 0x3b0   :  { %410 = vrot.lane.b32.xlu1 %v2152_v24, %s1863_s26 }
 0x3b4   :  { %661 = vrot.lane.b32.xlu1 %v2152_v24, %s1864_s23 }
 0x42c   :  { %v401_v41 = vpop.xlane.xlu1 %400 }
 0x42d   :  { %v402_v42 = vsub.f32 %v397_v39, %v401_v41 }
 0x42f   :  { %v403_v43 = vmul.f32 1.442695, %v402_v42 }
 0x430   :  { %v411_v44 = vpop.permute.xlu1 %410 }
 0x431   :  { %1815 = vpow2.f32 %v403_v43  ;;  %1635 = vmatpush3.msra.mxu1 %v411_v44  ;;  %v1008_v43 = vld [vmem:[%s2372_s8] sm:$0xff]  ;;  %v1009_v44 = vld [vmem:[%s2372_s8 + $0x8] sm:$0xff] }
 0x432   :  { %1639 = vmatprep.subr.mxu1 %v1858_v20 }
 0x434   :  { %v662_v46 = vpop.permute.xlu1 %661 }
 0x435   :  { %1650 = vmatpush3.xpose.msk.msra.mxu0 %vm316_vm3, %v662_v46  ;;  %v1010_v46 = vld [vmem:[%s2372_s8 + $0x10] sm:$0xff] }
 0x436   :  { %1659 = vmatprep.subr.mxu0 %v1858_v20 }
 0x438   :  { %1652 = vmatmul.mubr.msk.f32.vlgmr.msra.gmra.mrb[0].mxu0 %vm316_vm3, %v660_v48 }
 0x439   :  { %1661 = vmatprep.mubr.msk.f32.mxu0 %vm1859_vm2, %v1858_v20 }
 0x43b   :  { %v1816_v49 = vpop.eup %1815 }
 0x43c   :  { %v405_v51 = vsel %vm398_vm5, %v1816_v49, 0.0 }
 0x43d   :  { %406 = vadd.xlane.f32.xlu1 %v405_v51 }
 0x44e   :  { %835 = vrot.lane.b32.xlu1 %v2155_v25, %s1864_s23 }
 0x4ca   :  { %v407_v52 = vpop.xlane.xlu1 %406 }
 0x4cb   :  { %1817 = vrcp.f32 %v407_v52 }
 0x4ce   :  { %v836_v53 = vpop.permute.xlu1 %835 }
 0x4cf   :  { %1660 = vmatpush3.xpose.msk.msra.mxu0 %vm316_vm3, %v836_v53 }
 0x4d2   :  { %1662 = vmatmul.mubr.msk.f32.vlgmr.msra.gmra.mrb[2].mxu0 %vm316_vm3, %v834_v54 }
 0x4d5   :  { %v1818_v55 = vpop.eup %1817 }
 0x4d6   :  { %v409_v56 = vmul.f32 %v1818_v55, %v1816_v49 }
 0x4d8   :  { %1637 = vmatmul.mubr.msk.f32.vlgmr.msra.gmra.mrb[4].mxu1 %vm398_vm5, %v409_v56 }
 0x4d9   :  { %1640 = vmatpush3.xpose.msk.msra.mxu1 %vm316_vm3, %v489_v45  ;;  %1641 = vmatprep.mubr.msk.f32.mxu1 %vm1859_vm2, %v1858_v20  ;;  %v1745_v45 = vpack.c.bf16 %v1009_v44, %v1008_v43  ;;  %v1261_v43 = vld [vmem:[%s2408_s14 + $0x28] sm:$0xff] }
 0x4da   :  { %1644 = vmatprep.subr.mxu1 %v1858_v20 }
 0x4db   :  { %1746 = vmatprep.subr.bf16.mxu0 %v1745_v45 }
 0x4dc   :  { %1642 = vmatmul.mubr.msk.f32.vlgmr.msra.gmra.mrb[6].mxu1 %vm316_vm3, %v2155_v25  ;;  %1748 = vmatpush3.bf16.msra.mxu0 %v1745_v45  ;;  %v1262_v45 = vld [vmem:[%s2408_s14 + $0x30] sm:$0xff] }
 0x4dd   :  { %1646 = vmatprep.mubr.msk.f32.mxu1 %vm1859_vm2, %v1858_v20 }
 0x50b   :  { %v733_v57 = vpop.f32.mrb[0].mxu0 }
 0x50c   :  { %v737_v58 = vmul.f32 0.25, %v733_v57  ;;  %v1653_v59 = vpop.f32.mrb[1].mxu0 }
 0x50e   :  { %v738_v60 = vadd.f32 %v737_v58, %v2173_v33 }
 0x510   :  { %v739_v61 = vadd.f32 %v738_v60, %v396_v37  ;;  %v1546_v60 = vld [vmem:[%s2373_s9] ss:$0 sm:$0xff]  ;;  %s2412_s9 = sld [smem:[#allocation15_spill]] }
 0x512   :  { %v740_v62 = vsel %vm398_vm5, %v739_v61, -inf }
 0x513   :  { %741 = vmax.xlane.f32.xlu0 %v740_v62 }
 0x5a0   :  { %v742_v63 = vpop.xlane.xlu0 %741 }
 0x5a1   :  { %v743_v1 = vsub.f32 %v739_v61, %v742_v63 }
 0x5a3   :  { %v744_v7 = vmul.f32 1.442695, %v743_v1 }
 0x5a5   :  { %v907_v2 = vpop.f32.mrb[2].mxu0  ;;  %1819 = vpow2.f32 %v744_v7 }
 0x5a6   :  { %v911_v3 = vmul.f32 0.25, %v907_v2  ;;  %v1663_v4 = vpop.f32.mrb[3].mxu0 }
 0x5a8   :  { %v912_v6 = vadd.f32 %v911_v3, %v2173_v33 }
 0x5aa   :  { %v913_v8 = vadd.f32 %v912_v6, %v569_v5 }
 0x5ab   :  { %v482_v9 = vpop.f32.mrb[4].mxu1 }
 0x5ac   :  { %486 = vst.msk [vmem:[#allocation3] sm:$0xff] %vm316_vm3, %v482_v9  ;;  %v1638_v10 = vpop.f32.mrb[5].mxu1  ;;  %v914_v11 = vsel %vm398_vm5, %v913_v8, -inf }
 0x5ad   :  { %915 = vmax.xlane.f32.xlu0 %v914_v11 }
 0x5af   :  { %v560_v12 = vpop.f32.mrb[6].mxu1  ;;  %v1820_v18 = vpop.eup %1819 }
 0x5b0   :  { %v564_v13 = vmul.f32 0.25, %v560_v12  ;;  %v1643_v14 = vpop.f32.mrb[7].mxu1  ;;  %v746_v19 = vsel %vm398_vm5, %v1820_v18, 0.0 }
 0x5b1   :  { %v1147_v14 = vld [vmem:[%s2376_s12 + $0x8] sm:$0xff] }
 0x5b2   :  { %v565_v15 = vadd.f32 %v564_v13, %v2173_v33  ;;  %v1146_v13 = vld [vmem:[%s2376_s12] sm:$0xff] }
 0x5b4   :  { %v570_v16 = vadd.f32 %v569_v5, %v565_v15  ;;  %v1753_v15 = vpack.c.bf16 %v1147_v14, %v1146_v13 }
 0x5b6   :  { %v571_v17 = vsel %vm398_vm5, %v570_v16, -inf }
 0x5b7   :  { %572 = vmax.xlane.f32.xlu1 %v571_v17  ;;  %v1149_v17 = vld [vmem:[%s2376_s12 + $0x18] sm:$0xff] }
 0x5bb   :  { %747 = vadd.xlane.f32.xlu1 %v746_v19 }
 0x5cc   :  { %582 = vrot.lane.b32.xlu1 %v2155_v25, %s1863_s26 }
 0x5d0   :  { %925 = vrot.lane.b32.xlu1 %v2155_v25, %s1865_s28 }
 0x63a   :  { %v916_v21 = vpop.xlane.xlu0 %915 }
 0x63b   :  { %v917_v22 = vsub.f32 %v913_v8, %v916_v21 }
 0x63d   :  { %v918_v23 = vmul.f32 1.442695, %v917_v22 }
 0x63f   :  { %1821 = vpow2.f32 %v918_v23 }
 0x644   :  { %v573_v26 = vpop.xlane.xlu1 %572 }
 0x645   :  { %v574_v27 = vsub.f32 %v570_v16, %v573_v26  ;;  %v1148_v16 = vld [vmem:[%s2376_s12 + $0x10] sm:$0xff] }
 0x647   :  { %v575_v28 = vmul.f32 1.442695, %v574_v27 }
 0x648   :  { %v748_v29 = vpop.xlane.xlu1 %747 }
 0x649   :  { %v1822_v30 = vpop.eup %1821  ;;  %1823 = vpow2.f32 %v575_v28 }
 0x64a   :  { %v920_v31 = vsel %vm398_vm5, %v1822_v30, 0.0 }
 0x64b   :  { %921 = vadd.xlane.f32.xlu0 %v920_v31  ;;  %v1550_v31 = vld [vmem:[%s2375_s11] ss:$0 sm:$0xff]  ;;  %s2409_s11 = sld [smem:[#allocation12_spill]] }
 0x64c   :  { %v583_v32 = vpop.permute.xlu1 %582 }
 0x64d   :  { %1645 = vmatpush3.msra.mxu1 %v583_v32 }
 0x64e   :  { %1654 = vmatprep.subr.mxu1 %v1858_v20 }
 0x653   :  { %v1824_v33 = vpop.eup %1823 }
 0x654   :  { %v577_v25 = vsel %vm398_vm5, %v1824_v33, 0.0 }
 0x655   :  { %578 = vadd.xlane.f32.xlu0 %v577_v25 }
 0x66b   :  { %751 = vrot.lane.b32.xlu0 %v2152_v24, %s1865_s28  ;;  %v926_v24 = vpop.permute.xlu1 %925  ;;  %s2410_s28 = sld [smem:[#allocation14_spill]] }
 0x6d8   :  { %v922_v34 = vpop.xlane.xlu0 %921 }
 0x6e2   :  { %v579_v35 = vpop.xlane.xlu0 %578 }
 0x6e3   :  { %1825 = vrcp.f32 %v579_v35 }
 0x6e4   :  { %1827 = vrcp.f32 %v748_v29  ;;  %v1549_v29 = vld [vmem:[%s2374_s10] ss:$0 sm:$0xff] }
 0x6e5   :  { %1829 = vrcp.f32 %v922_v34 }
 0x6e6   :  { %v752_v39 = vpop.permute.xlu0 %751 }
 0x6ed   :  { %v1826_v36 = vpop.eup %1825 }
 0x6ee   :  { %v581_v37 = vmul.f32 %v1826_v36, %v1824_v33  ;;  %v1828_v38 = vpop.eup %1827 }
 0x6ef   :  { %v750_v40 = vmul.f32 %v1828_v38, %v1820_v18  ;;  %v1830_v41 = vpop.eup %1829  ;;  %v1757_v18 = vpack.c.bf16 %v1149_v17, %v1148_v16  ;;  %v1257_v38 = vld [vmem:[%s2408_s14 + $0x8] sm:$0xff] }
 0x6f0   :  { %1647 = vmatmul.mubr.msk.f32.vlgmr.msra.gmra.mrb[8].mxu1 %vm398_vm5, %v581_v37  ;;  %v924_v42 = vmul.f32 %v1830_v41, %v1822_v30  ;;  %v1256_v37 = vld [vmem:[%s2408_s14] sm:$0xff]  ;;  %v1259_v41 = vld [vmem:[%s2408_s14 + $0x18] sm:$0xff] }
 0x6f1   :  { %1655 = vmatpush3.msra.mxu1 %v752_v39  ;;  %1656 = vmatprep.mubr.msk.f32.mxu1 %vm1859_vm2, %v1858_v20  ;;  %v1761_v39 = vpack.c.bf16 %v1257_v38, %v1256_v37 }
 0x6f2   :  { %1664 = vmatprep.subr.mxu1 %v1858_v20 }
 0x6f4   :  { %1657 = vmatmul.mubr.msk.f32.vlgmr.msra.gmra.mrb[10].mxu1 %vm398_vm5, %v750_v40  ;;  %v1258_v40 = vld [vmem:[%s2408_s14 + $0x10] sm:$0xff] }
 0x6f5   :  { %1665 = vmatpush3.msra.mxu1 %v926_v24  ;;  %1666 = vmatprep.mubr.msk.f32.mxu1 %vm1859_vm2, %v1858_v20  ;;  %v1011_v20 = vld [vmem:[%s2372_s8 + $0x18] sm:$0xff]  ;;  %v1765_v24 = vpack.c.bf16 %v1259_v41, %v1258_v40  ;;  %v1401_v40 = vld [vmem:[%s2411_s3 + $0x8] sm:$0xff] }
 0x6f6   :  { %v1749_v48 = vpack.c.bf16 %v1011_v20, %v1010_v46  ;;  %1754 = vmatprep.subr.bf16.mxu1 %v1753_v15  ;;  %v1263_v46 = vld [vmem:[%s2408_s14 + $0x38] sm:$0xff] }
 0x6f7   :  { %v1773_v20 = vpack.c.bf16 %v1263_v46, %v1262_v45 }
 0x6f8   :  { %1667 = vmatmul.mubr.msk.f32.vlgmr.msra.gmra.mrb[12].mxu1 %vm398_vm5, %v924_v42  ;;  %1750 = vmatprep.subr.bf16.mxu0 %v1749_v48  ;;  %v1260_v42 = vld [vmem:[%s2408_s14 + $0x20] sm:$0xff] }
 0x6f9   :  { %1752 = vmatpush3.bf16.msra.mxu0 %v1749_v48  ;;  %1756 = vmatpush3.bf16.msra.mxu1 %v1753_v15  ;;  %v1769_v44 = vpack.c.bf16 %v1261_v43, %v1260_v42  ;;  %v1264_v48 = vld [vmem:[%s2408_s14 + $0x40] sm:$0xff]  ;;  %v1403_v42 = vld [vmem:[%s2411_s3 + $0x18] sm:$0xff] }
 0x6fa   :  { %1758 = vmatprep.subr.bf16.mxu1 %v1757_v18  ;;  %1762 = vmatprep.subr.bf16.mxu0 %v1761_v39 }
 0x6fd   :  { %1760 = vmatpush3.bf16.msra.mxu1 %v1757_v18 }
 0x7c3   :  { %v654_v49 = vpop.f32.mrb[8].mxu1 }
 0x7c4   :  { %658 = vst.msk [vmem:[#allocation3 + $0x8] sm:$0xff] %vm316_vm3, %v654_v49  ;;  %v1648_v51 = vpop.f32.mrb[9].mxu1  ;;  %v1265_v49 = vld [vmem:[%s2408_s14 + $0x48] sm:$0xff] }
 0x7c5   :  { %v1266_v51 = vld [vmem:[%s2408_s14 + $0x50] sm:$0xff] }
 0x7c7   :  { %v823_v52 = vpop.f32.mrb[10].mxu1 }
 0x7c8   :  { %828 = vrot.lane.b32.xlu1 %v823_v52, %s1866_s15  ;;  %v1658_v53 = vpop.f32.mrb[11].mxu1  ;;  %v1777_v52 = vpack.c.bf16 %v1265_v49, %v1264_v48 }
 0x7c9   :  { %v1267_v53 = vld [vmem:[%s2408_s14 + $0x58] sm:$0xff] }
 0x7cb   :  { %v997_v54 = vpop.f32.mrb[12].mxu1 }
 0x7cc   :  { %1002 = vrot.lane.b32.xlu1 %v997_v54, %s1866_s15  ;;  %v1668_v55 = vpop.f32.mrb[13].mxu1  ;;  %v1781_v54 = vpack.c.bf16 %v1267_v53, %v1266_v51 }
 0x7cd   :  { %v1268_v55 = vld [vmem:[%s2408_s14 + $0x60] sm:$0xff] }
 0x83a   :  { %v829_v56 = vpop.permute.xlu1 %828 }
 0x83b   :  { %832 = vst.msk [vmem:[#allocation3] sm:$0xff] %vm831_vm6, %v829_v56  ;;  %v1269_v56 = vld [vmem:[%s2408_s14 + $0x68] sm:$0xff] }
 0x83e   :  { %v1003_v57 = vpop.permute.xlu1 %1002 }
 0x83f   :  { %1005 = vst.msk [vmem:[#allocation3 + $0x8] sm:$0xff] %vm831_vm6, %v1003_v57  ;;  %v1785_v57 = vpack.c.bf16 %v1269_v56, %v1268_v55  ;;  %v1556_v56 = vld [vmem:[%s2413_s24] ss:$0 sm:$0xff] }
 0x842   :  { %v1006_v58 = vld [vmem:[#allocation3] sm:$0xff] }
 0x843   :  { %1677 = vmatprep.mubr.msk.f32.mxu0 %vm170_vm1, %v1006_v58  ;;  %v1270_v58 = vld [vmem:[%s2408_s14 + $0x70] sm:$0xff] }
 0x846   :  { %v1007_v59 = vld [vmem:[#allocation3 + $0x8] sm:$0xff] }
 0x847   :  { %1678 = vmatmul.mubr.msk.f32.vlgmr.msra.gmra.mrb[4].mxu0 %vm170_vm1, %v1007_v59  ;;  %v1271_v59 = vld [vmem:[%s2408_s14 + $0x78] sm:$0xff] }
 0x848   :  { %1764 = vmatpush3.bf16.msra.mxu0 %v1761_v39 }
 0x849   :  { %1766 = vmatprep.subr.bf16.mxu0 %v1765_v24 }
 0x84c   :  { %1768 = vmatpush3.bf16.msra.mxu0 %v1765_v24  ;;  %v1402_v24 = vld [vmem:[%s2411_s3 + $0x10] sm:$0xff] }
 0x84d   :  { %1770 = vmatprep.subr.bf16.mxu0 %v1769_v44  ;;  %v1797_v43 = vpack.c.bf16 %v1403_v42, %v1402_v24 }
 0x850   :  { %1772 = vmatpush3.bf16.msra.mxu0 %v1769_v44 }
 0x851   :  { %1774 = vmatprep.subr.bf16.mxu0 %v1773_v20 }
 0x854   :  { %1776 = vmatpush3.bf16.msra.mxu0 %v1773_v20 }
 0x855   :  { %1778 = vmatprep.subr.bf16.mxu0 %v1777_v52 }
 0x858   :  { %1780 = vmatpush3.bf16.msra.mxu0 %v1777_v52  ;;  %v1555_v52 = vld [vmem:[%s2412_s9] ss:$0 sm:$0xff] }
 0x859   :  { %1782 = vmatprep.subr.bf16.mxu0 %v1781_v54 }
 0x85c   :  { %1784 = vmatpush3.bf16.msra.mxu0 %v1781_v54 }
 0x85d   :  { %1786 = vmatprep.subr.bf16.mxu0 %v1785_v57 }
 0x860   :  { %1788 = vmatpush3.bf16.msra.mxu0 %v1785_v57 }
 0x91a   :  { %v1679_v61 = vpop.f32.mrb[4].mxu0 }
 0x91b   :  { %v1097_v62 = vadd.f32 %v1679_v61, %v1546_v60  ;;  %v1091_v63 = vpop.f32.mrb[5].mxu0  ;;  %v1551_v61 = vld [vmem:[%s2409_s11] ss:$0 sm:$0xff] }
 0x91c   :  { %v1092_v0 = vadd.f32 %v1546_v60, %v1091_v63  ;;  %v1789_v60 = vpack.c.bf16 %v1271_v59, %v1270_v58 }
 0x91d   :  { %v2242_v1 = vadd.f32 %v1097_v62, %v2115_v50 }
 0x91e   :  { %v2245_v2 = vadd.f32 %v1092_v0, %v2107_v47  ;;  %1790 = vmatprep.subr.bf16.mxu0 %v1789_v60 }
 0x91f   :  { %v1107_v3 = vsel %vm170_vm1, %v2242_v1, 0.0  ;;  %1792 = vmatpush3.bf16.msra.mxu0 %v1789_v60 }
 0x920   :  { %1108 = vadd.xlane.f32.xlu1 %v1107_v3  ;;  %v1104_v4 = vsel %vm170_vm1, %v2245_v2, 0.0 }
 0x921   :  { %1105 = vadd.xlane.f32.xlu0 %v1104_v4 }
 0x9ad   :  { %v1109_v5 = vpop.xlane.xlu1 %1108 }
 0x9ae   :  { %v1111_v6 = vmul.f32 0.03125, %v1109_v5  ;;  %v1106_v7 = vpop.xlane.xlu0 %1105 }
 0x9af   :  { %v1110_v8 = vmul.f32 0.03125, %v1106_v7 }
 0x9b0   :  { %v1113_v9 = vsub.f32 %v2242_v1, %v1111_v6 }
 0x9b1   :  { %v1112_v50 = vsub.f32 %v2245_v2, %v1110_v8 }
 0x9b2   :  { %v1115_v11 = vmul.f32 %v1113_v9, %v1113_v9 }
 0x9b3   :  { %v1114_v10 = vmul.f32 %v1112_v50, %v1112_v50 }
 0x9b4   :  { %v1119_v12 = vsel %vm170_vm1, %v1115_v11, 0.0 }
 0x9b5   :  { %v1116_v47 = vsel %vm170_vm1, %v1114_v10, 0.0 }
 0x9b6   :  { %1117 = vadd.xlane.f32.xlu0 %v1116_v47 }
 0x9ba   :  { %1120 = vadd.xlane.f32.xlu0 %v1119_v12 }
 0xa43   :  { %v1118_v19 = vpop.xlane.xlu0 %1117 }
 0xa44   :  { %v1122_v21 = vmul.f32 0.03125, %v1118_v19 }
 0xa46   :  { %v1124_v22 = vadd.f32 1e-05, %v1122_v21  ;;  %v1554_v21 = vld [vmem:[%s2410_s28] ss:$0 sm:$0xff] }
 0xa47   :  { %v1121_v23 = vpop.xlane.xlu0 %1120 }
 0xa48   :  { %1831 = vrsqrt.f32 %v1124_v22  ;;  %v1123_v26 = vmul.f32 0.03125, %v1121_v23 }
 0xa4a   :  { %v1125_v27 = vadd.f32 1e-05, %v1123_v26 }
 0xa4c   :  { %1833 = vrsqrt.f32 %v1125_v27 }
 0xa52   :  { %v1832_v28 = vpop.eup %1831 }
 0xa53   :  { %v1128_v30 = vmul.f32 %v1832_v28, %v1112_v50 }
 0xa55   :  { %v1136_v32 = vmul.f32 %v1549_v29, %v1128_v30 }
 0xa56   :  { %v1834_v33 = vpop.eup %1833 }
 0xa57   :  { %v1129_v25 = vmul.f32 %v1834_v33, %v1113_v9  ;;  %v1144_v34 = vadd.f32 %v1550_v31, %v1136_v32 }
 0xa59   :  { %v1137_v35 = vmul.f32 %v1549_v29, %v1129_v25  ;;  %1688 = vmatprep.mubr.msk.f32.mxu1 %vm170_vm1, %v1144_v34 }
 0xa5b   :  { %v1145_v36 = vadd.f32 %v1550_v31, %v1137_v35 }
 0xa5d   :  { %1689 = vmatmul.mubr.msk.f32.vlgmr.msra.gmra.mrb[14].mxu1 %vm170_vm1, %v1145_v36 }
 0xb30   :  { %v1690_v62 = vpop.f32.mrb[14].mxu1 }
 0xb31   :  { %v1235_v63 = vadd.f32 %v1690_v62, %v1551_v61  ;;  %v1229_v0 = vpop.f32.mrb[15].mxu1 }
 0xb32   :  { %v1230_v3 = vadd.f32 %v1551_v61, %v1229_v0  ;;  %v1557_v61 = vld [vmem:[%s2414_s30] ss:$0 sm:$0xff] }
 0xb33   :  { %v1239_v4 = vmul.f32 %v1235_v63, %v1235_v63 }
 0xb34   :  { %v1238_v5 = vmul.f32 %v1230_v3, %v1230_v3 }
 0xb35   :  { %v1241_v6 = vmul.f32 %v1239_v4, %v1235_v63 }
 0xb36   :  { %v1240_v7 = vmul.f32 %v1238_v5, %v1230_v3 }
 0xb37   :  { %v1243_v8 = vmul.f32 0.044715, %v1241_v6 }
 0xb38   :  { %v1242_v9 = vmul.f32 0.044715, %v1240_v7 }
 0xb39   :  { %v1245_v50 = vadd.f32 %v1243_v8, %v1235_v63 }
 0xb3a   :  { %v1244_v10 = vadd.f32 %v1242_v9, %v1230_v3 }
 0xb3b   :  { %v1247_v47 = vmul.f32 0.7978846, %v1245_v50 }
 0xb3c   :  { %v1246_v11 = vmul.f32 0.7978846, %v1244_v10 }
 0xb3d   :  { %1835 = vtanh.f32 %v1247_v47 }
 0xb3e   :  { %1837 = vtanh.f32 %v1246_v11 }
 0xb47   :  { %v1836_v12 = vpop.eup %1835 }
 0xb48   :  { %v1838_v13 = vpop.eup %1837  ;;  %v1251_v14 = vadd.f32 1.0, %v1836_v12 }
 0xb49   :  { %v1250_v15 = vadd.f32 1.0, %v1838_v13 }
 0xb4a   :  { %v1253_v16 = vmul.f32 0.5, %v1251_v14 }
 0xb4b   :  { %v1252_v17 = vmul.f32 0.5, %v1250_v15 }
 0xb4c   :  { %v1255_v19 = vmul.f32 %v1253_v16, %v1235_v63 }
 0xb4d   :  { %v1254_v18 = vmul.f32 %v1252_v17, %v1230_v3 }
 0xb4f   :  { %1723 = vmatprep.mubr.f32.mxu0 %v1254_v18 }
 0xb50   :  { %1724 = vmatmul.mubr.f32.vlgmr.msra.gmra.mrb[6].mxu0 %v1255_v19 }
 0xc23   :  { %v1725_v22 = vpop.f32.mrb[6].mxu0 }
 0xc24   :  { %v1351_v23 = vadd.f32 %v1725_v22, %v1554_v21  ;;  %v1345_v26 = vpop.f32.mrb[7].mxu0 }
 0xc25   :  { %v1346_v27 = vadd.f32 %v1554_v21, %v1345_v26 }
 0xc26   :  { %v1355_v28 = vadd.f32 %v1351_v23, %v2242_v1 }
 0xc27   :  { %v1354_v29 = vadd.f32 %v1346_v27, %v2245_v2  ;;  %v1400_v2 = vld [vmem:[%s2411_s3] sm:$0xff] }
 0xc28   :  { %v1361_v30 = vsel %vm170_vm1, %v1355_v28, 0.0  ;;  %v1793_v41 = vpack.c.bf16 %v1401_v40, %v1400_v2 }
 0xc29   :  { %1362 = vadd.xlane.f32.xlu1 %v1361_v30  ;;  %v1358_v31 = vsel %vm170_vm1, %v1354_v29, 0.0 }
 0xc2a   :  { %1359 = vadd.xlane.f32.xlu0 %v1358_v31  ;;  %1794 = vmatprep.subr.bf16.mxu1 %v1793_v41 }
 0xc2b   :  { %1796 = vmatpush3.bf16.msra.mxu1 %v1793_v41 }
 0xc2c   :  { %1798 = vmatprep.subr.bf16.mxu1 %v1797_v43 }
 0xc2f   :  { %1800 = vmatpush3.bf16.msra.mxu1 %v1797_v43 }
 0xcb6   :  { %v1363_v32 = vpop.xlane.xlu1 %1362 }
 0xcb7   :  { %v1365_v33 = vmul.f32 0.03125, %v1363_v32  ;;  %v1360_v25 = vpop.xlane.xlu0 %1359 }
 0xcb8   :  { %v1364_v34 = vmul.f32 0.03125, %v1360_v25 }
 0xcb9   :  { %v1367_v35 = vsub.f32 %v1355_v28, %v1365_v33 }
 0xcba   :  { %v1366_v36 = vsub.f32 %v1354_v29, %v1364_v34 }
 0xcbb   :  { %v1369_v37 = vmul.f32 %v1367_v35, %v1367_v35 }
 0xcbc   :  { %v1368_v38 = vmul.f32 %v1366_v36, %v1366_v36 }
 0xcbd   :  { %v1373_v39 = vsel %vm170_vm1, %v1369_v37, 0.0 }
 0xcbe   :  { %1374 = vadd.xlane.f32.xlu1 %v1373_v39  ;;  %v1370_v1 = vsel %vm170_vm1, %v1368_v38, 0.0 }
 0xcbf   :  { %1371 = vadd.xlane.f32.xlu0 %v1370_v1 }
 0xd4b   :  { %v1375_v44 = vpop.xlane.xlu1 %1374 }
 0xd4c   :  { %v1377_v45 = vmul.f32 0.03125, %v1375_v44  ;;  %v1372_v46 = vpop.xlane.xlu0 %1371 }
 0xd4d   :  { %v1376_v20 = vmul.f32 0.03125, %v1372_v46 }
 0xd4e   :  { %v1379_v48 = vadd.f32 1e-05, %v1377_v45 }
 0xd4f   :  { %v1378_v49 = vadd.f32 1e-05, %v1376_v20 }
 0xd50   :  { %1839 = vrsqrt.f32 %v1379_v48 }
 0xd51   :  { %1841 = vrsqrt.f32 %v1378_v49 }
 0xd5a   :  { %v1840_v51 = vpop.eup %1839 }
 0xd5b   :  { %v1842_v53 = vpop.eup %1841  ;;  %v1383_v54 = vmul.f32 %v1840_v51, %v1367_v35 }
 0xd5c   :  { %v1382_v55 = vmul.f32 %v1842_v53, %v1366_v36 }
 0xd5d   :  { %v1391_v57 = vmul.f32 %v1555_v52, %v1383_v54 }
 0xd5e   :  { %v1390_v58 = vmul.f32 %v1555_v52, %v1382_v55 }
 0xd5f   :  { %v1399_v60 = vadd.f32 %v1556_v56, %v1391_v57 }
 0xd60   :  { %v1398_v59 = vadd.f32 %v1556_v56, %v1390_v58 }
 0xd62   :  { %1734 = vmatprep.mubr.msk.f32.mxu1 %vm170_vm1, %v1398_v59 }
 0xd63   :  { %1735 = vmatmul.mubr.msk.f32.vlgmr.msra.gmra.mrb[16].mxu1 %vm170_vm1, %v1399_v60 }
 0xe36   :  { %v1736_v62 = vpop.f32.mrb[16].mxu1 }
 0xe37   :  { %v1489_v63 = vadd.f32 %v1736_v62, %v1557_v61  ;;  %v1483_v0 = vpop.f32.mrb[17].mxu1 }
 0xe38   :  { %v1484_v3 = vadd.f32 %v1557_v61, %v1483_v0 }
 0xe39   :  { %1493 = vst [vmem:[%s2415_s19 + $0x8] sm:$0xff] %v1489_v63 }
 0xe3a   :  { %1492 = vst [vmem:[%s2415_s19] sm:$0xff] %v1484_v3 }

</bundles_post_ra>
